<compile_context>
chip_gen: v6e
topology: v6e:2x2x1
jax: 0.10.0
libtpu: 0.0.40
codegen_flags: <defaults>
</compile_context>

<pallas_src>
import functools
import math

import numpy as np
import jax
import jax.numpy as jnp
from jax.experimental import pallas as pl
from jax.experimental.pallas import tpu as pltpu


OUT_MODAL = ['SMILES', 'Graph', '3D', 'Side effect',
             'Drug Sensitivity (NCI60)', 'Text', 'Drug Ontology', 'Drug target']
RAW_MODAL = OUT_MODAL[2:7]          # modalities read from the raw-data table
LN_EPS = 1e-5


def _fs(shape):
    """Full-extent BlockSpec for a grid=(1,) pallas_call."""
    return pl.BlockSpec(shape, lambda i: (0,) * len(shape))


_ARB = pltpu.CompilerParams(dimension_semantics=("arbitrary",))


# ----------------------------- fused Pallas kernel ---------------------------

def _heads_kernel(nbr_ref, aggw_ref, aggb_ref, lng_ref, lnb_ref,
                  xcat_ref, wbd_ref, bcat_ref,
                  w1a_ref, w1b_ref, w1g_ref, time_gt_ref,
                  w2_ref, b2_ref, w3_ref, b3_ref,
                  pred_ref, xc_ref, *, batch, n_hop, n_heads, d, eps):
    B = batch

    # ---- (1) KG aggregation + Linear + LayerNorm for [gene ; tgtA ; tgtB] rows.
    # Mean/max chunks are lane-concatenated so ONE K=2*n_hop*E (=128) dot hits the MXU.
    ne = nbr_ref[...]                                        # [3B, n_hop, n_mem, E] f32
    chunks = []
    for h in range(n_hop):                                   # mirrors _interaction_aggregation
        nh = ne[:, h]                                        # [3B, n_mem, E]
        chunks.append(jnp.mean(nh, axis=1))
        chunks.append(jnp.max(nh, axis=1))
    feat = jnp.concatenate(chunks, axis=-1)                  # [3B, 2*n_hop*E]
    y = jnp.dot(feat, aggw_ref[...], preferred_element_type=jnp.float32) + aggb_ref[...]
    mu = jnp.mean(y, axis=-1, keepdims=True)                 # LayerNorm (f32 throughout)
    var = jnp.mean(jnp.square(y - mu), axis=-1, keepdims=True)
    yn = (y - mu) * jax.lax.rsqrt(var + eps)                 # [3B, D]
    g = lng_ref[...]                                         # [2, D]  row0=gene, row1=drug
    bt = lnb_ref[...]
    gene_emb = yn[:B] * g[0:1] + bt[0:1]                     # [B, D]
    tgt = yn[B:] * g[1:2] + bt[1:2]                          # [2B, D]
    tgt_a, tgt_b = tgt[:B], tgt[B:]

    # ---- (2) the 7 projection heads as ONE block-diagonal matmul (a & b rows stacked).
    proj = (jnp.dot(xcat_ref[...], wbd_ref[...], preferred_element_type=jnp.float32)
            + bcat_ref[...])                                 # [2B, 7D]
    proj3 = proj.reshape(2 * B, n_heads - 1, d)
    a_heads = jnp.concatenate([proj3[:B], tgt_a[:, None, :]], axis=1)   # [B, 8, D]
    b_heads = jnp.concatenate([proj3[B:], tgt_b[:, None, :]], axis=1)   # [B, 8, D]

    # ---- (3) classifier_1 factored per-modality; 64 combos via broadcast add.
    pa = jnp.dot(a_heads.reshape(B * n_heads, d), w1a_ref[...],
                 preferred_element_type=jnp.float32)         # [B*8, 2D]
    pb = jnp.dot(b_heads.reshape(B * n_heads, d), w1b_ref[...],
                 preferred_element_type=jnp.float32)         # [B*8, 2D]
    gt = (jnp.dot(gene_emb, w1g_ref[...], preferred_element_type=jnp.float32)
          + time_gt_ref[...])                                # [B, 2D] (time path + b1 pre-folded)
    d2 = gt.shape[-1]
    h1 = (pa.reshape(B, n_heads, 1, d2) + pb.reshape(B, 1, n_heads, d2)
          + gt.reshape(B, 1, 1, d2))                         # [B, 8, 8, 2D]
    h1 = jnp.maximum(h1, 0.0)                                # ReLU (dropout = id, eval)

    # Only combos 0 and 1 are consumed downstream (cosine loss) -> tiny writeback.
    xc_ref[...] = h1[:, 0, 0:2, :].astype(xc_ref.dtype)      # [B, 2, 2D]

    # ---- classifier_2: Linear(2D->D) + ReLU + Linear(D->1) as a lane reduce.
    h1f = h1.reshape(B * n_heads * n_heads, d2)              # [B*64, 2D]
    h2 = jnp.maximum(jnp.dot(h1f, w2_ref[...], preferred_element_type=jnp.float32)
                     + b2_ref[...], 0.0)                     # [B*64, D]
    p = jnp.sum(h2.reshape(B, n_heads * n_heads, d) * w3_ref[...], axis=-1) + b3_ref[0]
    pred_ref[...] = p.astype(pred_ref.dtype)                 # lane-dense [B, 64]


def pallas_heads_core(nbr_emb, x_cat, time_gt, prep):
    """Single fused pallas_call. Returns (pred [B, 64], xc [B, 2, 2D])."""
    R, n_hop, n_mem, E = nbr_emb.shape
    B = R // 3
    D = prep['agg_w'].shape[1]
    D2 = 2 * D
    NH = len(OUT_MODAL)
    C = NH * NH
    sumK = x_cat.shape[1]
    NP = (NH - 1) * D

    kern = functools.partial(_heads_kernel, batch=B, n_hop=n_hop, n_heads=NH,
                             d=D, eps=LN_EPS)
    pred, xc = pl.pallas_call(
        kern,
        out_shape=(jax.ShapeDtypeStruct((B, C), jnp.float32),
                   jax.ShapeDtypeStruct((B, 2, D2), jnp.float32)),
        grid=(1,),
        in_specs=[_fs((R, n_hop, n_mem, E)),
                  _fs((2 * n_hop * E, D)), _fs((1, D)),
                  _fs((2, D)), _fs((2, D)),
                  _fs((2 * B, sumK)), _fs((sumK, NP)), _fs((1, NP)),
                  _fs((D, D2)), _fs((D, D2)), _fs((D, D2)), _fs((B, D2)),
                  _fs((D2, D)), _fs((1, D)), _fs((1, D)),
                  pl.BlockSpec(memory_space=pltpu.MemorySpace.SMEM)],
        out_specs=(_fs((B, C)), _fs((B, 2, D2))),
        compiler_params=_ARB,
    )(nbr_emb, prep['agg_w'], prep['agg_b'], prep['ln_g'], prep['ln_b'],
      x_cat, prep['w_bd'], prep['b_cat'],
      prep['w1a'], prep['w1b'], prep['w1g'], time_gt,
      prep['w2'], prep['b2'], prep['w3'], prep['b3'])
    return pred, xc


# ----------------------------- glue (plain JAX / once-off prep) ---------------

def _block_diag(mats):
    rows = sum(m.shape[0] for m in mats)
    cols = sum(m.shape[1] for m in mats)
    out = jnp.zeros((rows, cols), mats[0].dtype)
    r = c = 0
    for m in mats:
        out = out.at[r:r + m.shape[0], c:c + m.shape[1]].set(m)
        r += m.shape[0]
        c += m.shape[1]
    return out


def make_time_table(time_dim=200, max_len=1000):
    pe = np.zeros([max_len, time_dim], dtype=np.float32)
    position = np.arange(0, max_len).reshape(max_len, 1)
    div_term = np.exp(np.arange(0, time_dim, 2) * -(math.log(10000.0) / time_dim))
    pe[:, 0::2] = np.sin(position * div_term)
    pe[:, 1::2] = np.cos(position * div_term)
    return jnp.asarray(pe)


def cosine_loss(anchor, positive):
    a = anchor / jnp.linalg.norm(anchor, axis=-1, keepdims=True)
    p = positive / jnp.linalg.norm(positive, axis=-1, keepdims=True)
    logits = a @ p.T
    logits = logits - jnp.max(logits, axis=1, keepdims=True)
    logp = jax.nn.log_softmax(logits, axis=-1)
    targets = jnp.arange(logits.shape[1])
    return -jnp.mean(logp[jnp.arange(logits.shape[0]), targets])


def prepare_params(params, tables, cfg):
    """Hoist every weight/table-derived constant out of the per-step forward."""
    D = cfg['inner_dim']
    prep = {}
    # block-diagonal projection weight for the 7 non-target heads (x_cat column order)
    head_ws = [params['tproj_w'], params['gproj_w'], params['d3d_w'], params['sider_w'],
               params['nci60_w'], params['text_w'], params['dron_w']]
    head_bs = [params['tproj_b'], params['gproj_b'], params['d3d_b'], params['sider_b'],
               params['nci60_b'], params['text_b'], params['dron_b']]
    prep['w_bd'] = _block_diag(head_ws)                         # [sumK, 7D]
    prep['b_cat'] = jnp.concatenate(head_bs, axis=0)[None, :]   # [1, 7D]
    # classifier_1 slabs (input order a | b | gene | time)
    w1 = params['cls1_w']                                       # [4D, 2D]
    prep['w1a'], prep['w1b'], prep['w1g'] = w1[:D], w1[D:2 * D], w1[2 * D:3 * D]
    w1t = w1[3 * D:]
    # time path folded into a single gather table: time_layer -> classifier_1 slice,
    # with cls1_b pre-added (it is shared by every combo row).
    time_proj = tables['time_table'] @ params['time_w'] + params['time_b'][None, :]
    prep['time_gt_table'] = time_proj @ w1t + params['cls1_b'][None, :]   # [1000, 2D]
    # KG aggregation + LayerNorm constants
    prep['agg_w'] = params['agg_w']                              # [2*n_hop*E, D]
    prep['agg_b'] = params['agg_b'][None, :]
    prep['ln_g'] = jnp.stack([params['ln_gene_g'], params['ln_drug_g']], axis=0)
    prep['ln_b'] = jnp.stack([params['ln_gene_b'], params['ln_drug_b']], axis=0)
    # classifier_2
    prep['w2'] = params['cls2a_w']                               # [2D, D]
    prep['b2'] = params['cls2a_b'][None, :]
    prep['w3'] = params['cls2b_w'].reshape(1, D)                 # [D,1] column -> row
    prep['b3'] = params['cls2b_b'].reshape(1).astype(jnp.float32)   # SMEM scalar
    # WTA head
    prep['wta_w'], prep['wta_b'] = params['wta_w'], params['wta_b']
    # concatenated raw-modality table: one gather per drug per forward
    prep['raw_cat'] = jnp.concatenate([tables['raw'][m] for m in RAW_MODAL], axis=1)
    # embedding / neighbor tables
    prep['protein_emb'] = params['protein_emb']
    prep['gene_neighbor'] = tables['gene_neighbor']
    prep['drug_neighbor'] = tables['drug_neighbor']
    prep['time_table_rows'] = tables['time_table'].shape[0]
    return prep


def init_params(key, cfg):
    D = cfg['inner_dim']
    E = D                      # emb_dim = inner_dim in the module
    keys = iter(jax.random.split(key, 32))

    def lin(k, fin, fout):
        w = jax.random.normal(k, (fin, fout), jnp.float32) / math.sqrt(fin)
        b = jnp.zeros((fout,), jnp.float32)
        return w, b

    p = {}
    p['protein_emb'] = 0.02 * jax.random.normal(
        next(keys), (cfg['protein_num'] + cfg['drug_n'], E), jnp.float32)
    p['agg_w'], p['agg_b'] = lin(next(keys), E * 2 * cfg['n_hop'], D)
    p['tproj_w'], p['tproj_b'] = lin(next(keys), cfg['input_dim'], D)
    p['gproj_w'], p['gproj_b'] = lin(next(keys), cfg['dv_input_dim'], D)
    p['ln_gene_g'], p['ln_gene_b'] = jnp.ones((D,)), jnp.zeros((D,))
    p['ln_drug_g'], p['ln_drug_b'] = jnp.ones((D,)), jnp.zeros((D,))
    p['time_w'], p['time_b'] = lin(next(keys), cfg['time_dim'], D)
    p['sider_w'], p['sider_b'] = lin(next(keys), cfg['mod_dims']['Side effect'], D)
    p['nci60_w'], p['nci60_b'] = lin(next(keys), cfg['mod_dims']['Drug Sensitivity (NCI60)'], D)
    p['dron_w'], p['dron_b'] = lin(next(keys), cfg['mod_dims']['Drug Ontology'], D)
    p['text_w'], p['text_b'] = lin(next(keys), cfg['mod_dims']['Text'], D)
    p['d3d_w'], p['d3d_b'] = lin(next(keys), cfg['mod_dims']['3D'], D)
    p['cls1_w'], p['cls1_b'] = lin(next(keys), 4 * D, 2 * D)
    p['cls2a_w'], p['cls2a_b'] = lin(next(keys), 2 * D, D)
    p['cls2b_w'], p['cls2b_b'] = lin(next(keys), D, 1)
    p['wta_w'], p['wta_b'] = lin(next(keys), len(OUT_MODAL) ** 2, 1)
    return p


def init_tables(key, cfg):
    ks = jax.random.split(key, 4)
    t = {}
    t['time_table'] = make_time_table(cfg['time_dim'], 1000)
    t['gene_neighbor'] = jax.random.randint(
        ks[0], (cfg['num_cells'], cfg['n_hop'], cfg['n_memory']), 0, cfg['protein_num'])
    t['drug_neighbor'] = jax.random.randint(
        ks[1], (cfg['drug_n'], cfg['n_hop'], cfg['n_memory']), 0,
        cfg['protein_num'] + cfg['drug_n'])
    raw = {}
    for i, (mod, dim) in enumerate(cfg['mod_dims'].items()):
        raw[mod] = jax.random.normal(jax.random.fold_in(ks[2], i),
                                     (cfg['drug_n'], dim), jnp.float32)
    t['raw'] = raw
    return t


def heads_classify_forward(prep, drug_a, dv_drug_a, drug_b, dv_drug_b,
                           gene_exps, time_idx, pair, topk=2):
    B = drug_a.shape[0]
    ida, idb = pair[:, 0], pair[:, 1]
    cell_ids = gene_exps[:, 0]

    # KG neighbor embeddings for [gene-exp ; drug-target A ; drug-target B] rows
    all_nbrs = jnp.concatenate([prep['gene_neighbor'][cell_ids],
                                prep['drug_neighbor'][ida],
                                prep['drug_neighbor'][idb]], axis=0)        # [3B, h, m]
    nbr_emb = jnp.take(prep['protein_emb'], all_nbrs, axis=0)              # [3B, h, m, E]

    # Stacked inputs for the 7 projection heads (a-rows then b-rows)
    raw_a = prep['raw_cat'][ida]
    raw_b = prep['raw_cat'][idb]
    x_cat = jnp.concatenate(
        [jnp.concatenate([drug_a, drug_b], axis=0),
         jnp.concatenate([dv_drug_a, dv_drug_b], axis=0),
         jnp.concatenate([raw_a, raw_b], axis=0)], axis=1)                  # [2B, sumK]

    # Time path precomputed through classifier_1 (cls1_b folded in) -> one gather
    time_gt = prep['time_gt_table'][time_idx[:, 0]]                         # [B, 2D]

    # ---- the single fused Pallas kernel ----
    pred, xc = pallas_heads_core(nbr_emb, x_cat, time_gt, prep)             # [B,64],[B,2,2D]

    # modality-presence mask is unused: Heads_WTA is configured with is_mask=False.

    # ---- WTA head ----
    # TODO(synk): Heads_WTA class is not in the reference source; approximated as
    # keep-topk winner-take-all followed by Linear(64 -> 1) (is_linear=True, is_mask=False).
    kth = jnp.sort(pred, axis=-1)[:, -topk][:, None]
    wta_in = jnp.where(pred >= kth, pred, 0.0)
    out = wta_in @ prep['wta_w'] + prep['wta_b']                            # [B, 1]

    # TODO(synk): original uses np.random.choice of two distinct combo indices;
    # fixed to (0, 1) for determinism.
    xc_1, xc_2 = xc[:, 0, :], xc[:, 1, :]
    # classifier_2(all_combo_emb[:, c, :]) == pred[:, c] exactly (dropout = identity in eval),
    # so sub_out is indexed from pred instead of re-running two Linear chains.
    sub_out = 0.5 * (pred[:, 0] + pred[:, 1])
    consine = cosine_loss(xc_1, xc_2)

    return out.reshape(-1, 1), consine, sub_out.reshape(-1, 1)


# ----------------------------------- main -------------------------------------

if __name__ == "__main__":
    key = jax.random.PRNGKey(0)
    B = 2
    cfg = dict(inner_dim=32, input_dim=48, dv_input_dim=40, n_memory=8, n_hop=2,
               time_dim=200, protein_num=50, drug_n=6, num_cells=5,
               mod_dims={'3D': 36, 'Side effect': 20, 'Drug Sensitivity (NCI60)': 24,
                         'Text': 28, 'Drug Ontology': 16})

    k_par, k_tab, k_in = jax.random.split(key, 3)
    params = init_params(k_par, cfg)
    tables = init_tables(k_tab, cfg)
    prep = prepare_params(params, tables, cfg)     # weight-derived constants, built once

    ks = jax.random.split(k_in, 7)
    drug_a = jax.random.normal(ks[0], (B, cfg['input_dim']), jnp.float32)
    drug_b = jax.random.normal(ks[1], (B, cfg['input_dim']), jnp.float32)
    dv_drug_a = jax.random.normal(ks[2], (B, cfg['dv_input_dim']), jnp.float32)
    dv_drug_b = jax.random.normal(ks[3], (B, cfg['dv_input_dim']), jnp.float32)
    gene_exps = jax.random.randint(ks[4], (B, 1), 0, cfg['num_cells'])
    time_idx = jax.random.randint(ks[5], (B, 1), 0, 1000)
    pair = jax.random.randint(ks[6], (B, 2), 0, cfg['drug_n'])

    fwd = jax.jit(heads_classify_forward)
    out, consine, sub_out = fwd(prep, drug_a, dv_drug_a, drug_b, dv_drug_b,
                                gene_exps, time_idx, pair)
    jax.block_until_ready((out, consine, sub_out))

    assert out.shape == (B, 1) and sub_out.shape == (B, 1) and consine.shape == ()
    assert bool(jnp.all(jnp.isfinite(out))) and bool(jnp.isfinite(consine))
    assert bool(jnp.all(jnp.isfinite(sub_out)))
    print("KERNEL_OK")
</pallas_src>

<mosaic_0001>
module attributes {stable_mosaic.version = 11 : i64} {
  func.func @_heads_kernel(%arg0: i32, %arg1: memref<6x2x8x32xf32, #tpu.memory_space<vmem>>, %arg2: memref<128x32xf32, #tpu.memory_space<vmem>>, %arg3: memref<1x32xf32, #tpu.memory_space<vmem>>, %arg4: memref<2x32xf32, #tpu.memory_space<vmem>>, %arg5: memref<2x32xf32, #tpu.memory_space<vmem>>, %arg6: memref<4x212xf32, #tpu.memory_space<vmem>>, %arg7: memref<212x224xf32, #tpu.memory_space<vmem>>, %arg8: memref<1x224xf32, #tpu.memory_space<vmem>>, %arg9: memref<32x64xf32, #tpu.memory_space<vmem>>, %arg10: memref<32x64xf32, #tpu.memory_space<vmem>>, %arg11: memref<32x64xf32, #tpu.memory_space<vmem>>, %arg12: memref<2x64xf32, #tpu.memory_space<vmem>>, %arg13: memref<64x32xf32, #tpu.memory_space<vmem>>, %arg14: memref<1x32xf32, #tpu.memory_space<vmem>>, %arg15: memref<1x32xf32, #tpu.memory_space<vmem>>, %arg16: memref<1xf32, #tpu.memory_space<smem>>, %arg17: memref<2x64xf32, #tpu.memory_space<vmem>>, %arg18: memref<2x2x64xf32, #tpu.memory_space<vmem>>) attributes {dimension_semantics = [#tpu.dimension_semantics<arbitrary>], iteration_bounds = array<i64: 1>, scalar_prefetch = 0 : i64, scratch_operands = 0 : i64, tpu.core_type = #tpu.core_type<tc>, window_params = [{pipeline_mode = #tpu.pipeline_mode<synchronous>, transform_indices = @transform_0, window_bounds = array<i64: 6, 2, 8, 32>}, {pipeline_mode = #tpu.pipeline_mode<synchronous>, transform_indices = @transform_1, window_bounds = array<i64: 128, 32>}, {pipeline_mode = #tpu.pipeline_mode<synchronous>, transform_indices = @transform_2, window_bounds = array<i64: 1, 32>}, {pipeline_mode = #tpu.pipeline_mode<synchronous>, transform_indices = @transform_3, window_bounds = array<i64: 2, 32>}, {pipeline_mode = #tpu.pipeline_mode<synchronous>, transform_indices = @transform_4, window_bounds = array<i64: 2, 32>}, {pipeline_mode = #tpu.pipeline_mode<synchronous>, transform_indices = @transform_5, window_bounds = array<i64: 4, 212>}, {pipeline_mode = #tpu.pipeline_mode<synchronous>, transform_indices = @transform_6, window_bounds = array<i64: 212, 224>}, {pipeline_mode = #tpu.pipeline_mode<synchronous>, transform_indices = @transform_7, window_bounds = array<i64: 1, 224>}, {pipeline_mode = #tpu.pipeline_mode<synchronous>, transform_indices = @transform_8, window_bounds = array<i64: 32, 64>}, {pipeline_mode = #tpu.pipeline_mode<synchronous>, transform_indices = @transform_9, window_bounds = array<i64: 32, 64>}, {pipeline_mode = #tpu.pipeline_mode<synchronous>, transform_indices = @transform_10, window_bounds = array<i64: 32, 64>}, {pipeline_mode = #tpu.pipeline_mode<synchronous>, transform_indices = @transform_11, window_bounds = array<i64: 2, 64>}, {pipeline_mode = #tpu.pipeline_mode<synchronous>, transform_indices = @transform_12, window_bounds = array<i64: 64, 32>}, {pipeline_mode = #tpu.pipeline_mode<synchronous>, transform_indices = @transform_13, window_bounds = array<i64: 1, 32>}, {pipeline_mode = #tpu.pipeline_mode<synchronous>, transform_indices = @transform_14, window_bounds = array<i64: 1, 32>}, {transform_indices = @transform_15, window_bounds = array<i64: 1>}, {pipeline_mode = #tpu.pipeline_mode<synchronous>, transform_indices = @transform_16, window_bounds = array<i64: 2, 64>}, {pipeline_mode = #tpu.pipeline_mode<synchronous>, transform_indices = @transform_17, window_bounds = array<i64: 2, 2, 64>}]} {
    %c0 = arith.constant 0 : index
    %c0_0 = arith.constant 0 : index
    %c0_1 = arith.constant 0 : index
    %c0_2 = arith.constant 0 : index
    %0 = vector.load %arg1[%c0, %c0_0, %c0_1, %c0_2] : memref<6x2x8x32xf32, #tpu.memory_space<vmem>>, vector<6x2x8x32xf32>
    %1 = vector.extract_strided_slice %0 {offsets = [0, 0, 0, 0], sizes = [6, 1, 8, 32], strides = [1, 1, 1, 1]} : vector<6x2x8x32xf32> to vector<6x1x8x32xf32>
    %2 = vector.shape_cast %1 : vector<6x1x8x32xf32> to vector<6x8x32xf32>
    %cst = arith.constant dense<0.000000e+00> : vector<6x32xf32>
    %3 = vector.multi_reduction <add>, %2, %cst [1] : vector<6x8x32xf32> to vector<6x32xf32>
    %cst_3 = arith.constant 8.000000e+00 : f32
    %4 = vector.broadcast %cst_3 : f32 to vector<6x32xf32>
    %5 = arith.divf %3, %4 : vector<6x32xf32>
    %cst_4 = arith.constant dense<0xFF800000> : vector<6x32xf32>
    %6 = vector.multi_reduction <maximumf>, %2, %cst_4 [1] : vector<6x8x32xf32> to vector<6x32xf32>
    %7 = vector.extract_strided_slice %0 {offsets = [0, 1, 0, 0], sizes = [6, 1, 8, 32], strides = [1, 1, 1, 1]} : vector<6x2x8x32xf32> to vector<6x1x8x32xf32>
    %8 = vector.shape_cast %7 : vector<6x1x8x32xf32> to vector<6x8x32xf32>
    %cst_5 = arith.constant dense<0.000000e+00> : vector<6x32xf32>
    %9 = vector.multi_reduction <add>, %8, %cst_5 [1] : vector<6x8x32xf32> to vector<6x32xf32>
    %cst_6 = arith.constant 8.000000e+00 : f32
    %10 = vector.broadcast %cst_6 : f32 to vector<6x32xf32>
    %11 = arith.divf %9, %10 : vector<6x32xf32>
    %cst_7 = arith.constant dense<0xFF800000> : vector<6x32xf32>
    %12 = vector.multi_reduction <maximumf>, %8, %cst_7 [1] : vector<6x8x32xf32> to vector<6x32xf32>
    %13 = tpu.concatenate %5, %6, %11, %12 in 1 : vector<6x32xf32>, vector<6x32xf32>, vector<6x32xf32>, vector<6x32xf32> -> vector<6x128xf32>
    %c0_8 = arith.constant 0 : index
    %c0_9 = arith.constant 0 : index
    %14 = vector.load %arg2[%c0_8, %c0_9] : memref<128x32xf32, #tpu.memory_space<vmem>>, vector<128x32xf32>
    %cst_10 = arith.constant dense<0.000000e+00> : vector<6x32xf32>
    %15 = tpu.matmul %13, %14, %cst_10 {dimension_numbers = #tpu.dot_dimension_numbers<[1], [0], [0], [1], [0, 0, 1, 1], [], []>} : vector<6x128xf32>, vector<128x32xf32>, vector<6x32xf32> -> vector<6x32xf32>
    %c0_11 = arith.constant 0 : index
    %c0_12 = arith.constant 0 : index
    %16 = vector.load %arg3[%c0_11, %c0_12] : memref<1x32xf32, #tpu.memory_space<vmem>>, vector<1x32xf32>
    %17 = vector.broadcast %16 : vector<1x32xf32> to vector<6x32xf32>
    %18 = arith.addf %15, %17 : vector<6x32xf32>
    %cst_13 = arith.constant dense<0.000000e+00> : vector<6xf32>
    %19 = vector.multi_reduction <add>, %18, %cst_13 [1] : vector<6x32xf32> to vector<6xf32>
    %20 = vector.shape_cast %19 : vector<6xf32> to vector<6x1xf32>
    %cst_14 = arith.constant 3.200000e+01 : f32
    %21 = vector.broadcast %cst_14 : f32 to vector<6x1xf32>
    %22 = arith.divf %20, %21 : vector<6x1xf32>
    %23 = vector.broadcast %22 : vector<6x1xf32> to vector<6x32xf32>
    %24 = arith.subf %18, %23 : vector<6x32xf32>
    %25 = arith.mulf %24, %24 : vector<6x32xf32>
    %cst_15 = arith.constant dense<0.000000e+00> : vector<6xf32>
    %26 = vector.multi_reduction <add>, %25, %cst_15 [1] : vector<6x32xf32> to vector<6xf32>
    %27 = vector.shape_cast %26 : vector<6xf32> to vector<6x1xf32>
    %cst_16 = arith.constant 3.200000e+01 : f32
    %28 = vector.broadcast %cst_16 : f32 to vector<6x1xf32>
    %29 = arith.divf %27, %28 : vector<6x1xf32>
    %30 = vector.broadcast %22 : vector<6x1xf32> to vector<6x32xf32>
    %31 = arith.subf %18, %30 : vector<6x32xf32>
    %cst_17 = arith.constant 9.99999974E-6 : f32
    %32 = vector.broadcast %cst_17 : f32 to vector<6x1xf32>
    %33 = arith.addf %29, %32 : vector<6x1xf32>
    %34 = math.rsqrt %33 : vector<6x1xf32>
    %35 = vector.broadcast %34 : vector<6x1xf32> to vector<6x32xf32>
    %36 = arith.mulf %31, %35 : vector<6x32xf32>
    %c0_18 = arith.constant 0 : index
    %c0_19 = arith.constant 0 : index
    %37 = vector.load %arg4[%c0_18, %c0_19] : memref<2x32xf32, #tpu.memory_space<vmem>>, vector<2x32xf32>
    %c0_20 = arith.constant 0 : index
    %c0_21 = arith.constant 0 : index
    %38 = vector.load %arg5[%c0_20, %c0_21] : memref<2x32xf32, #tpu.memory_space<vmem>>, vector<2x32xf32>
    %39 = vector.extract_strided_slice %36 {offsets = [0, 0], sizes = [2, 32], strides = [1, 1]} : vector<6x32xf32> to vector<2x32xf32>
    %40 = vector.extract_strided_slice %37 {offsets = [0, 0], sizes = [1, 32], strides = [1, 1]} : vector<2x32xf32> to vector<1x32xf32>
    %41 = vector.broadcast %40 : vector<1x32xf32> to vector<2x32xf32>
    %42 = arith.mulf %39, %41 : vector<2x32xf32>
    %43 = vector.extract_strided_slice %38 {offsets = [0, 0], sizes = [1, 32], strides = [1, 1]} : vector<2x32xf32> to vector<1x32xf32>
    %44 = vector.broadcast %43 : vector<1x32xf32> to vector<2x32xf32>
    %45 = arith.addf %42, %44 : vector<2x32xf32>
    %46 = vector.extract_strided_slice %36 {offsets = [2, 0], sizes = [4, 32], strides = [1, 1]} : vector<6x32xf32> to vector<4x32xf32>
    %47 = vector.extract_strided_slice %37 {offsets = [1, 0], sizes = [1, 32], strides = [1, 1]} : vector<2x32xf32> to vector<1x32xf32>
    %48 = vector.broadcast %47 : vector<1x32xf32> to vector<4x32xf32>
    %49 = arith.mulf %46, %48 : vector<4x32xf32>
    %50 = vector.extract_strided_slice %38 {offsets = [1, 0], sizes = [1, 32], strides = [1, 1]} : vector<2x32xf32> to vector<1x32xf32>
    %51 = vector.broadcast %50 : vector<1x32xf32> to vector<4x32xf32>
    %52 = arith.addf %49, %51 : vector<4x32xf32>
    %53 = vector.extract_strided_slice %52 {offsets = [0, 0], sizes = [2, 32], strides = [1, 1]} : vector<4x32xf32> to vector<2x32xf32>
    %54 = vector.extract_strided_slice %52 {offsets = [2, 0], sizes = [2, 32], strides = [1, 1]} : vector<4x32xf32> to vector<2x32xf32>
    %c0_22 = arith.constant 0 : index
    %c0_23 = arith.constant 0 : index
    %55 = vector.load %arg6[%c0_22, %c0_23] : memref<4x212xf32, #tpu.memory_space<vmem>>, vector<4x212xf32>
    %c0_24 = arith.constant 0 : index
    %c0_25 = arith.constant 0 : index
    %56 = vector.load %arg7[%c0_24, %c0_25] : memref<212x224xf32, #tpu.memory_space<vmem>>, vector<212x224xf32>
    %cst_26 = arith.constant dense<0.000000e+00> : vector<4x224xf32>
    %57 = tpu.matmul %55, %56, %cst_26 {dimension_numbers = #tpu.dot_dimension_numbers<[1], [0], [0], [1], [0, 0, 1, 1], [], []>} : vector<4x212xf32>, vector<212x224xf32>, vector<4x224xf32> -> vector<4x224xf32>
    %c0_27 = arith.constant 0 : index
    %c0_28 = arith.constant 0 : index
    %58 = vector.load %arg8[%c0_27, %c0_28] : memref<1x224xf32, #tpu.memory_space<vmem>>, vector<1x224xf32>
    %59 = vector.broadcast %58 : vector<1x224xf32> to vector<4x224xf32>
    %60 = arith.addf %57, %59 : vector<4x224xf32>
    %61 = vector.shape_cast %60 : vector<4x224xf32> to vector<4x7x32xf32>
    %62 = vector.extract_strided_slice %61 {offsets = [0, 0, 0], sizes = [2, 7, 32], strides = [1, 1, 1]} : vector<4x7x32xf32> to vector<2x7x32xf32>
    %63 = vector.shape_cast %53 : vector<2x32xf32> to vector<2x1x32xf32>
    %64 = tpu.concatenate %62, %63 in 1 : vector<2x7x32xf32>, vector<2x1x32xf32> -> vector<2x8x32xf32>
    %65 = vector.extract_strided_slice %61 {offsets = [2, 0, 0], sizes = [2, 7, 32], strides = [1, 1, 1]} : vector<4x7x32xf32> to vector<2x7x32xf32>
    %66 = vector.shape_cast %54 : vector<2x32xf32> to vector<2x1x32xf32>
    %67 = tpu.concatenate %65, %66 in 1 : vector<2x7x32xf32>, vector<2x1x32xf32> -> vector<2x8x32xf32>
    %68 = vector.shape_cast %64 : vector<2x8x32xf32> to vector<16x32xf32>
    %c0_29 = arith.constant 0 : index
    %c0_30 = arith.constant 0 : index
    %69 = vector.load %arg9[%c0_29, %c0_30] : memref<32x64xf32, #tpu.memory_space<vmem>>, vector<32x64xf32>
    %cst_31 = arith.constant dense<0.000000e+00> : vector<16x64xf32>
    %70 = tpu.matmul %68, %69, %cst_31 {dimension_numbers = #tpu.dot_dimension_numbers<[1], [0], [0], [1], [0, 0, 1, 1], [], []>} : vector<16x32xf32>, vector<32x64xf32>, vector<16x64xf32> -> vector<16x64xf32>
    %71 = vector.shape_cast %67 : vector<2x8x32xf32> to vector<16x32xf32>
    %c0_32 = arith.constant 0 : index
    %c0_33 = arith.constant 0 : index
    %72 = vector.load %arg10[%c0_32, %c0_33] : memref<32x64xf32, #tpu.memory_space<vmem>>, vector<32x64xf32>
    %cst_34 = arith.constant dense<0.000000e+00> : vector<16x64xf32>
    %73 = tpu.matmul %71, %72, %cst_34 {dimension_numbers = #tpu.dot_dimension_numbers<[1], [0], [0], [1], [0, 0, 1, 1], [], []>} : vector<16x32xf32>, vector<32x64xf32>, vector<16x64xf32> -> vector<16x64xf32>
    %c0_35 = arith.constant 0 : index
    %c0_36 = arith.constant 0 : index
    %74 = vector.load %arg11[%c0_35, %c0_36] : memref<32x64xf32, #tpu.memory_space<vmem>>, vector<32x64xf32>
    %cst_37 = arith.constant dense<0.000000e+00> : vector<2x64xf32>
    %75 = tpu.matmul %45, %74, %cst_37 {dimension_numbers = #tpu.dot_dimension_numbers<[1], [0], [0], [1], [0, 0, 1, 1], [], []>} : vector<2x32xf32>, vector<32x64xf32>, vector<2x64xf32> -> vector<2x64xf32>
    %c0_38 = arith.constant 0 : index
    %c0_39 = arith.constant 0 : index
    %76 = vector.load %arg12[%c0_38, %c0_39] : memref<2x64xf32, #tpu.memory_space<vmem>>, vector<2x64xf32>
    %77 = arith.addf %75, %76 : vector<2x64xf32>
    %78 = vector.shape_cast %70 : vector<16x64xf32> to vector<2x8x1x64xf32>
    %79 = vector.shape_cast %73 : vector<16x64xf32> to vector<2x1x8x64xf32>
    %80 = vector.broadcast %78 : vector<2x8x1x64xf32> to vector<2x8x8x64xf32>
    %81 = vector.broadcast %79 : vector<2x1x8x64xf32> to vector<2x8x8x64xf32>
    %82 = arith.addf %80, %81 : vector<2x8x8x64xf32>
    %83 = vector.shape_cast %77 : vector<2x64xf32> to vector<2x1x1x64xf32>
    %84 = vector.broadcast %83 : vector<2x1x1x64xf32> to vector<2x8x8x64xf32>
    %85 = arith.addf %82, %84 : vector<2x8x8x64xf32>
    %cst_40 = arith.constant 0.000000e+00 : f32
    %86 = vector.broadcast %cst_40 : f32 to vector<2x8x8x64xf32>
    %87 = arith.maximumf %85, %86 : vector<2x8x8x64xf32>
    %88 = vector.extract_strided_slice %87 {offsets = [0, 0, 0, 0], sizes = [2, 1, 2, 64], strides = [1, 1, 1, 1]} : vector<2x8x8x64xf32> to vector<2x1x2x64xf32>
    %89 = vector.shape_cast %88 : vector<2x1x2x64xf32> to vector<2x2x64xf32>
    %c0_41 = arith.constant 0 : index
    %c0_42 = arith.constant 0 : index
    %c0_43 = arith.constant 0 : index
    %90 = vector.load %arg18[%c0_41, %c0_42, %c0_43] : memref<2x2x64xf32, #tpu.memory_space<vmem>>, vector<2x2x64xf32>
    tpu.vector_store %arg18[%c0_41, %c0_42, %c0_43], %89 {strides = array<i32>} : memref<2x2x64xf32, #tpu.memory_space<vmem>>, vector<2x2x64xf32>,
    %91 = vector.shape_cast %87 : vector<2x8x8x64xf32> to vector<128x64xf32>
    %c0_44 = arith.constant 0 : index
    %c0_45 = arith.constant 0 : index
    %92 = vector.load %arg13[%c0_44, %c0_45] : memref<64x32xf32, #tpu.memory_space<vmem>>, vector<64x32xf32>
    %cst_46 = arith.constant dense<0.000000e+00> : vector<128x32xf32>
    %93 = tpu.matmul %91, %92, %cst_46 {dimension_numbers = #tpu.dot_dimension_numbers<[1], [0], [0], [1], [0, 0, 1, 1], [], []>} : vector<128x64xf32>, vector<64x32xf32>, vector<128x32xf32> -> vector<128x32xf32>
    %c0_47 = arith.constant 0 : index
    %c0_48 = arith.constant 0 : index
    %94 = vector.load %arg14[%c0_47, %c0_48] : memref<1x32xf32, #tpu.memory_space<vmem>>, vector<1x32xf32>
    %95 = vector.broadcast %94 : vector<1x32xf32> to vector<128x32xf32>
    %96 = arith.addf %93, %95 : vector<128x32xf32>
    %cst_49 = arith.constant 0.000000e+00 : f32
    %97 = vector.broadcast %cst_49 : f32 to vector<128x32xf32>
    %98 = arith.maximumf %96, %97 : vector<128x32xf32>
    %99 = vector.shape_cast %98 : vector<128x32xf32> to vector<2x64x32xf32>
    %c0_50 = arith.constant 0 : index
    %c0_51 = arith.constant 0 : index
    %100 = vector.load %arg15[%c0_50, %c0_51] : memref<1x32xf32, #tpu.memory_space<vmem>>, vector<1x32xf32>
    %101 = vector.shape_cast %100 : vector<1x32xf32> to vector<1x1x32xf32>
    %102 = vector.broadcast %101 : vector<1x1x32xf32> to vector<2x64x32xf32>
    %103 = arith.mulf %99, %102 : vector<2x64x32xf32>
    %cst_52 = arith.constant dense<0.000000e+00> : vector<2x64xf32>
    %104 = vector.multi_reduction <add>, %103, %cst_52 [2] : vector<2x64x32xf32> to vector<2x64xf32>
    %c0_53 = arith.constant 0 : index
    %105 = memref.load %arg16[%c0_53] : memref<1xf32, #tpu.memory_space<smem>>
    %106 = vector.broadcast %105 : f32 to vector<2x64xf32>
    %107 = arith.addf %104, %106 : vector<2x64xf32>
    %c0_54 = arith.constant 0 : index
    %c0_55 = arith.constant 0 : index
    %108 = vector.load %arg17[%c0_54, %c0_55] : memref<2x64xf32, #tpu.memory_space<vmem>>, vector<2x64xf32>
    tpu.vector_store %arg17[%c0_54, %c0_55], %107 {strides = array<i32>} : memref<2x64xf32, #tpu.memory_space<vmem>>, vector<2x64xf32>,
    return
  }
  func.func @transform_0(%arg0: i32) -> (i32, i32, i32, i32) {
    %c0_i32 = arith.constant 0 : i32
    %c0_i32_0 = arith.constant 0 : i32
    %c0_i32_1 = arith.constant 0 : i32
    %c0_i32_2 = arith.constant 0 : i32
    %c0_i32_3 = arith.constant 0 : i32
    return %c0_i32, %c0_i32_0, %c0_i32_1, %c0_i32_2 : i32, i32, i32, i32
  }
  func.func @transform_1(%arg0: i32) -> (i32, i32) {
    %c0_i32 = arith.constant 0 : i32
    %c0_i32_0 = arith.constant 0 : i32
    %c0_i32_1 = arith.constant 0 : i32
    return %c0_i32, %c0_i32_0 : i32, i32
  }
  func.func @transform_2(%arg0: i32) -> (i32, i32) {
    %c0_i32 = arith.constant 0 : i32
    %c0_i32_0 = arith.constant 0 : i32
    %c0_i32_1 = arith.constant 0 : i32
    return %c0_i32, %c0_i32_0 : i32, i32
  }
  func.func @transform_3(%arg0: i32) -> (i32, i32) {
    %c0_i32 = arith.constant 0 : i32
    %c0_i32_0 = arith.constant 0 : i32
    %c0_i32_1 = arith.constant 0 : i32
    return %c0_i32, %c0_i32_0 : i32, i32
  }
  func.func @transform_4(%arg0: i32) -> (i32, i32) {
    %c0_i32 = arith.constant 0 : i32
    %c0_i32_0 = arith.constant 0 : i32
    %c0_i32_1 = arith.constant 0 : i32
    return %c0_i32, %c0_i32_0 : i32, i32
  }
  func.func @transform_5(%arg0: i32) -> (i32, i32) {
    %c0_i32 = arith.constant 0 : i32
    %c0_i32_0 = arith.constant 0 : i32
    %c0_i32_1 = arith.constant 0 : i32
    return %c0_i32, %c0_i32_0 : i32, i32
  }
  func.func @transform_6(%arg0: i32) -> (i32, i32) {
    %c0_i32 = arith.constant 0 : i32
    %c0_i32_0 = arith.constant 0 : i32
    %c0_i32_1 = arith.constant 0 : i32
    return %c0_i32, %c0_i32_0 : i32, i32
  }
  func.func @transform_7(%arg0: i32) -> (i32, i32) {
    %c0_i32 = arith.constant 0 : i32
    %c0_i32_0 = arith.constant 0 : i32
    %c0_i32_1 = arith.constant 0 : i32
    return %c0_i32, %c0_i32_0 : i32, i32
  }
  func.func @transform_8(%arg0: i32) -> (i32, i32) {
    %c0_i32 = arith.constant 0 : i32
    %c0_i32_0 = arith.constant 0 : i32
    %c0_i32_1 = arith.constant 0 : i32
    return %c0_i32, %c0_i32_0 : i32, i32
  }
  func.func @transform_9(%arg0: i32) -> (i32, i32) {
    %c0_i32 = arith.constant 0 : i32
    %c0_i32_0 = arith.constant 0 : i32
    %c0_i32_1 = arith.constant 0 : i32
    return %c0_i32, %c0_i32_0 : i32, i32
  }
  func.func @transform_10(%arg0: i32) -> (i32, i32) {
    %c0_i32 = arith.constant 0 : i32
    %c0_i32_0 = arith.constant 0 : i32
    %c0_i32_1 = arith.constant 0 : i32
    return %c0_i32, %c0_i32_0 : i32, i32
  }
  func.func @transform_11(%arg0: i32) -> (i32, i32) {
    %c0_i32 = arith.constant 0 : i32
    %c0_i32_0 = arith.constant 0 : i32
    %c0_i32_1 = arith.constant 0 : i32
    return %c0_i32, %c0_i32_0 : i32, i32
  }
  func.func @transform_12(%arg0: i32) -> (i32, i32) {
    %c0_i32 = arith.constant 0 : i32
    %c0_i32_0 = arith.constant 0 : i32
    %c0_i32_1 = arith.constant 0 : i32
    return %c0_i32, %c0_i32_0 : i32, i32
  }
  func.func @transform_13(%arg0: i32) -> (i32, i32) {
    %c0_i32 = arith.constant 0 : i32
    %c0_i32_0 = arith.constant 0 : i32
    %c0_i32_1 = arith.constant 0 : i32
    return %c0_i32, %c0_i32_0 : i32, i32
  }
  func.func @transform_14(%arg0: i32) -> (i32, i32) {
    %c0_i32 = arith.constant 0 : i32
    %c0_i32_0 = arith.constant 0 : i32
    %c0_i32_1 = arith.constant 0 : i32
    return %c0_i32, %c0_i32_0 : i32, i32
  }
  func.func @transform_15(%arg0: i32) -> i32 {
    %c0_i32 = arith.constant 0 : i32
    %c0_i32_0 = arith.constant 0 : i32
    return %c0_i32 : i32
  }
  func.func @transform_16(%arg0: i32) -> (i32, i32) {
    %c0_i32 = arith.constant 0 : i32
    %c0_i32_0 = arith.constant 0 : i32
    %c0_i32_1 = arith.constant 0 : i32
    return %c0_i32, %c0_i32_0 : i32, i32
  }
  func.func @transform_17(%arg0: i32) -> (i32, i32, i32) {
    %c0_i32 = arith.constant 0 : i32
    %c0_i32_0 = arith.constant 0 : i32
    %c0_i32_1 = arith.constant 0 : i32
    %c0_i32_2 = arith.constant 0 : i32
    return %c0_i32, %c0_i32_0, %c0_i32_1 : i32, i32, i32
  }
}

</mosaic_0001>

<bundles_post_ra>
// kernel: heads_classify_forward.1
= control target key start
LH: loop header
LB: loop body
LE: loop exit
PB: predicated region body
PF: predicated region fallthrough
CT: control target
= control target key end

     0   :  { %vm68_vm0 = vcmask 261120   ;;  %vm256_vm1 = vcmask 1041409   ;;  %vm258_vm2 = vcmask 1042434   ;;  %vm260_vm3 = vcmask 1043459   ;;  %s1919_s25 = smov 64   ;;  %s1920_s23 = smov 96   ;;  %s2737_s0 = inlined_call_operand.vmem [shape: f32[6,2,8,32], index: 0, kind: input, shape index: {}]   ;;  %s2738_s1 = inlined_call_operand.vmem [shape: f32[128,32], index: 1, kind: input, shape index: {}]   ;;  %s2739_s6 = inlined_call_operand.vmem [shape: f32[212,224], index: 6, kind: input, shape index: {}]   ;;  %s2740_s5 = inlined_call_operand.vmem [shape: f32[4,212], index: 5, kind: input, shape index: {}]   ;;  %s2741_s2 = inlined_call_operand.vmem [shape: f32[1,32], index: 2, kind: input, shape index: {}]   ;;  %s2742_s7 = inlined_call_operand.vmem [shape: f32[1,224], index: 7, kind: input, shape index: {}]   ;;  %s2743_s8 = inlined_call_operand.vmem [shape: f32[32,64], index: 8, kind: input, shape index: {}]   ;;  %s2744_s9 = inlined_call_operand.vmem [shape: f32[32,64], index: 9, kind: input, shape index: {}]   ;;  %s2745_s3 = inlined_call_operand.vmem [shape: f32[2,32], index: 3, kind: input, shape index: {}]   ;;  %s2746_s4 = inlined_call_operand.vmem [shape: f32[2,32], index: 4, kind: input, shape index: {}]   ;;  %s2747_s10 = inlined_call_operand.vmem [shape: f32[32,64], index: 10, kind: input, shape index: {}]   ;;  %s2748_s12 = inlined_call_operand.vmem [shape: f32[64,32], index: 12, kind: input, shape index: {}]   ;;  %s2749_s11 = inlined_call_operand.vmem [shape: f32[2,64], index: 11, kind: input, shape index: {}]   ;;  %s2750_s17 = inlined_call_operand.vmem [shape: f32[2,2,64], index: 17, kind: output, shape index: {1}]   ;;  %s2751_s13 = inlined_call_operand.vmem [shape: f32[1,32], index: 13, kind: input, shape index: {}]   ;;  %s2752_s14 = inlined_call_operand.vmem [shape: f32[1,32], index: 14, kind: input, shape index: {}]   ;;  %s2753_s15 = inlined_call_operand.<no memory space> [shape: f32[1], index: 15, kind: input, shape index: {}]   ;;  %s2754_s16 = inlined_call_operand.vmem [shape: f32[2,64], index: 16, kind: output, shape index: {0}]  }
   0x1   :  { %2757 = sst [smem:[#allocation3_spill]] %s2737_s0  ;;  %vm262_vm4 = vcmask 1044484   ;;  %vm264_vm5 = vcmask 1045509   ;;  %vm1921_vm6 = vmmov 0   ;;  %vm513_vm7 = vcmask 687104  }
   0x2   :  { %2758 = sst [smem:[#allocation4_spill]] %s2738_s1  ;;  %vm516_vm8 = vcmask 1043456   ;;  %vm310_vm9 = vcmask 523264   ;;  %vm312_vm10 = vcmask 785408   ;;  %vm407_vm11 = vcmask 259072  }
   0x3   :  { %s2759_s26 = sld [smem:[#allocation3_spill]]  ;;  %vm713_vm12 = vcmask 1046528   ;;  %vm1260_vm13 = vcmask 517120   ;;  %vm1603_vm14 = vcmask 130112   ;;  %vm1610_vm15 = vcmask 195712  }
   0x4   :  { %s2760_s22 = sld [smem:[#allocation4_spill]] }
   0x9   :  { %v56_v0 = vld [vmem:[%s2759_s26] sm:$0xff]  ;;  %v58_v1 = vld [vmem:[%s2759_s26 + $0x10] sm:$0xff]  ;;  %v2055_v16 = vld [vmem:[%s2759_s26 + $0x8] sm:$0xff] }
   0xa   :  { %v60_v2 = vld [vmem:[%s2759_s26 + $0x20] sm:$0xff]  ;;  %v62_v3 = vld [vmem:[%s2759_s26 + $0x30] sm:$0xff]  ;;  %v2031_v5 = vsel %vm68_vm0, %v58_v1, 0.0  ;;  %v118_v7 = vsel %vm68_vm0, %v56_v0, -inf  ;;  %v125_v18 = vsel %vm68_vm0, %v58_v1, -inf  ;;  %v160_v28 = vsel %vm68_vm0, %v2055_v16, 0.0 }
   0xb   :  { %v64_v4 = vld [vmem:[%s2759_s26 + $0x40] sm:$0xff]  ;;  %v2034_v6 = vsel %vm68_vm0, %v60_v2, 0.0  ;;  %v66_v8 = vld [vmem:[%s2759_s26 + $0x50] sm:$0xff]  ;;  %v77_v9 = vrot.slane %v2031_v5, 4  ;;  %v2042_v10 = vsel %vm68_vm0, %v62_v3, 0.0  ;;  %v119_v15 = vrot.slane %v118_v7, 4 }
   0xc   :  { %v2045_v11 = vsel %vm68_vm0, %v64_v4, 0.0  ;;  %v84_v12 = vrot.slane %v2034_v6, 4  ;;  %v91_v13 = vrot.slane %v2042_v10, 4  ;;  %v2050_v14 = vsel %vm68_vm0, %v66_v8, 0.0  ;;  %v2069_v33 = vld [vmem:[%s2759_s26 + $0x18] sm:$0xff]  ;;  %v61_v52 = vld [vmem:[%s2759_s26 + $0x28] sm:$0xff] }
   0xd   :  { %v98_v17 = vrot.slane %v2045_v11, 4  ;;  %v132_v19 = vsel %vm68_vm0, %v60_v2, -inf  ;;  %v139_v20 = vsel %vm68_vm0, %v62_v3, -inf  ;;  %v120_v21 = vmax.f32 %v118_v7, %v119_v15  ;;  %v2082_v61 = vld [vmem:[%s2759_s26 + $0x38] sm:$0xff]  ;;  %v2087_v62 = vld [vmem:[%s2759_s26 + $0x48] sm:$0xff] }
   0xe   :  { %v126_v22 = vrot.slane %v125_v18, 4  ;;  %v133_v23 = vrot.slane %v132_v19, 4  ;;  %v140_v24 = vrot.slane %v139_v20, 4  ;;  %v105_v25 = vrot.slane %v2050_v14, 4 }
   0xf   :  { %v146_v26 = vsel %vm68_vm0, %v64_v4, -inf  ;;  %v153_v27 = vsel %vm68_vm0, %v66_v8, -inf  ;;  %v121_v29 = vrot.slane %v120_v21, 2  ;;  %v2072_v36 = vsel %vm68_vm0, %v56_v0, 0.0 }
  0x10   :  { %v127_v30 = vmax.f32 %v125_v18, %v126_v22  ;;  %v134_v31 = vmax.f32 %v132_v19, %v133_v23  ;;  %v141_v32 = vmax.f32 %v139_v20, %v140_v24  ;;  %v147_v34 = vrot.slane %v146_v26, 4  ;;  %v2094_v20 = vld [vmem:[%s2759_s26 + $0x58] sm:$0xff]  ;;  %s1917_s26 = smov 32  }
  0x11   :  { %v154_v35 = vrot.slane %v153_v27, 4  ;;  %v161_v37 = vrot.slane %v160_v28, 4  ;;  %v122_v38 = vmax.f32 %v120_v21, %v121_v29  ;;  %v167_v45 = vsel %vm68_vm0, %v2069_v33, 0.0 }
  0x12   :  { %v128_v39 = vrot.slane %v127_v30, 2  ;;  %v135_v40 = vrot.slane %v134_v31, 2  ;;  %v142_v41 = vrot.slane %v141_v32, 2  ;;  %v148_v42 = vmax.f32 %v146_v26, %v147_v34 }
  0x13   :  { %v155_v43 = vmax.f32 %v153_v27, %v154_v35  ;;  %v162_v44 = vadd.f32 %v161_v37, %v160_v28  ;;  %v123_v46 = vrot.slane %v122_v38, 1  ;;  %v168_v54 = vrot.slane %v167_v45, 4 }
  0x14   :  { %v129_v47 = vmax.f32 %v127_v30, %v128_v39  ;;  %v136_v48 = vmax.f32 %v134_v31, %v135_v40  ;;  %v143_v49 = vmax.f32 %v141_v32, %v142_v41  ;;  %v149_v50 = vrot.slane %v148_v42, 2 }
  0x15   :  { %v156_v51 = vrot.slane %v155_v43, 2  ;;  %v163_v53 = vrot.slane %v162_v44, 2  ;;  %v124_v55 = vmax.f32 %v122_v38, %v123_v46  ;;  %v169_v0 = vadd.f32 %v168_v54, %v167_v45 }
  0x16   :  { %v130_v56 = vrot.slane %v129_v47, 1  ;;  %v137_v57 = vrot.slane %v136_v48, 1  ;;  %v144_v58 = vrot.slane %v143_v49, 1  ;;  %v150_v59 = vmax.f32 %v148_v42, %v149_v50 }
  0x17   :  { %v157_v60 = vmax.f32 %v155_v43, %v156_v51  ;;  %v164_v63 = vadd.f32 %v163_v53, %v162_v44  ;;  %v174_v4 = vsel %vm68_vm0, %v61_v52, 0.0  ;;  %v170_v18 = vrot.slane %v169_v0, 2 }
  0x18   :  { %v131_v1 = vmax.f32 %v129_v47, %v130_v56  ;;  %v138_v2 = vmax.f32 %v136_v48, %v137_v57  ;;  %v145_v3 = vmax.f32 %v143_v49, %v144_v58  ;;  %v151_v7 = vrot.slane %v150_v59, 1 }
  0x19   :  { %v158_v8 = vrot.slane %v157_v60, 1  ;;  %v165_v15 = vrot.slane %v164_v63, 1  ;;  %v175_v21 = vrot.slane %v174_v4, 4  ;;  %v181_v22 = vsel %vm68_vm0, %v2082_v61, 0.0 }
  0x1a   :  { %v273_v19 = vsel %vm256_vm1, %v131_v1, %v124_v55  ;;  %v188_v23 = vsel %vm68_vm0, %v2087_v62, 0.0  ;;  %v152_v24 = vmax.f32 %v150_v59, %v151_v7  ;;  %v171_v30 = vadd.f32 %v170_v18, %v169_v0 }
  0x1b   :  { %v159_v26 = vmax.f32 %v157_v60, %v158_v8  ;;  %v274_v27 = vsel %vm258_vm2, %v138_v2, %v273_v19  ;;  %v166_v28 = vadd.f32 %v165_v15, %v164_v63  ;;  %v176_v31 = vadd.f32 %v175_v21, %v174_v4 }
  0x1c   :  { %v275_v29 = vsel %vm260_vm3, %v145_v3, %v274_v27  ;;  %v182_v32 = vrot.slane %v181_v22, 4  ;;  %v189_v35 = vrot.slane %v188_v23, 4  ;;  %v195_v37 = vsel %vm68_vm0, %v2094_v20, 0.0 }
  0x1d   :  { %v276_v34 = vsel %vm262_vm4, %v152_v24, %v275_v29  ;;  %v202_v38 = vmul.f32 0.125, %v166_v28  ;;  %v172_v40 = vrot.slane %v171_v30, 1  ;;  %v177_v41 = vrot.slane %v176_v31, 2 }
  0x1e   :  { %v277_v39 = vsel %vm264_vm5, %v159_v26, %v276_v34  ;;  %v183_v42 = vadd.f32 %v182_v32, %v181_v22  ;;  %v190_v43 = vadd.f32 %v189_v35, %v188_v23  ;;  %v196_v44 = vrot.slane %v195_v37, 4 }
  0x1f   :  { %278 = vrot.lane.b32.xlu0 %v277_v39, %s1917_s26  ;;  %v208_v45 = vsel %vm68_vm0, %v2055_v16, -inf  ;;  %v215_v46 = vsel %vm68_vm0, %v2069_v33, -inf  ;;  %v173_v47 = vadd.f32 %v172_v40, %v171_v30  ;;  %v178_v48 = vadd.f32 %v177_v41, %v176_v31 }
  0x20   :  { %v184_v49 = vrot.slane %v183_v42, 2  ;;  %v209_v50 = vrot.slane %v208_v45, 4  ;;  %v191_v51 = vrot.slane %v190_v43, 2  ;;  %v197_v53 = vadd.f32 %v196_v44, %v195_v37  ;;  %v329_v44 = vld [vmem:[%s2760_s22 + $0x78] sm:$0xff] }
  0x21   :  { %v216_v54 = vrot.slane %v215_v46, 4  ;;  %v222_v55 = vsel %vm68_vm0, %v61_v52, -inf  ;;  %v179_v56 = vrot.slane %v178_v48, 1  ;;  %v203_v58 = vmul.f32 0.125, %v173_v47 }
  0x22   :  { %v185_v57 = vadd.f32 %v184_v49, %v183_v42  ;;  %v210_v59 = vmax.f32 %v208_v45, %v209_v50  ;;  %v192_v60 = vadd.f32 %v191_v51, %v190_v43  ;;  %v198_v63 = vrot.slane %v197_v53, 2 }
  0x23   :  { %v217_v0 = vmax.f32 %v215_v46, %v216_v54  ;;  %v223_v16 = vrot.slane %v222_v55, 4  ;;  %v180_v1 = vadd.f32 %v179_v56, %v178_v48  ;;  %v287_v33 = vsel %vm256_vm1, %v203_v58, %v202_v38  ;;  %v327_v56 = vld [vmem:[%s2760_s22 + $0x68] sm:$0xff] }
  0x24   :  { %v186_v2 = vrot.slane %v185_v57, 1  ;;  %v211_v3 = vrot.slane %v210_v59, 2  ;;  %v193_v4 = vrot.slane %v192_v60, 1  ;;  %v199_v7 = vadd.f32 %v198_v63, %v197_v53  ;;  %v328_v53 = vld [vmem:[%s2760_s22 + $0x70] sm:$0xff] }
  0x25   :  { %v218_v8 = vrot.slane %v217_v0, 2  ;;  %v224_v15 = vmax.f32 %v222_v55, %v223_v16  ;;  %v204_v19 = vmul.f32 0.125, %v180_v1  ;;  %v229_v21 = vsel %vm68_vm0, %v2082_v61, -inf }
  0x26   :  { %v187_v18 = vadd.f32 %v186_v2, %v185_v57  ;;  %v212_v52 = vmax.f32 %v210_v59, %v211_v3  ;;  %v194_v22 = vadd.f32 %v193_v4, %v192_v60  ;;  %v200_v23 = vrot.slane %v199_v7, 1  ;;  %v326_v2 = vld [vmem:[%s2760_s22 + $0x60] sm:$0xff] }
  0x27   :  { %v219_v24 = vmax.f32 %v217_v0, %v218_v8  ;;  %v225_v26 = vrot.slane %v224_v15, 2  ;;  %v288_v28 = vsel %vm258_vm2, %v204_v19, %v287_v33  ;;  %v230_v30 = vrot.slane %v229_v21, 4  ;;  %v476_v0 = vld [vmem:[%s2739_s6 + $0xf8] sm:$0xff] }
  0x28   :  { %v205_v27 = vmul.f32 0.125, %v187_v18  ;;  %v213_v29 = vrot.slane %v212_v52, 1  ;;  %v201_v31 = vadd.f32 %v200_v23, %v199_v7  ;;  %v206_v32 = vmul.f32 0.125, %v194_v22  ;;  %523 = vmatprep.subr.mxu1 %v476_v0  ;;  %v471_v18 = vld [vmem:[%s2739_s6 + $0xd0] sm:$0xff]  ;;  %v461_v0 = vld [vmem:[%s2739_s6 + $0x80] sm:$0xff] }
  0x29   :  { %v220_v34 = vrot.slane %v219_v24, 1  ;;  %v226_v35 = vmax.f32 %v224_v15, %v225_v26  ;;  %v231_v39 = vmax.f32 %v229_v21, %v230_v30  ;;  %v236_v61 = vsel %vm68_vm0, %v2087_v62, -inf  ;;  %v470_v21 = vld [vmem:[%s2739_s6 + $0xc8] sm:$0xff]  ;;  %v468_v30 = vld [vmem:[%s2739_s6 + $0xb8] sm:$0xff] }
  0x2a   :  { %v289_v37 = vsel %vm260_vm3, %v205_v27, %v288_v28  ;;  %v214_v38 = vmax.f32 %v212_v52, %v213_v29  ;;  %v207_v40 = vmul.f32 0.125, %v201_v31  ;;  %v237_v46 = vrot.slane %v236_v61, 4  ;;  %v324_v28 = vld [vmem:[%s2760_s22 + $0x50] sm:$0xff] }
  0x2b   :  { %v290_v41 = vsel %vm262_vm4, %v206_v32, %v289_v37  ;;  %v221_v42 = vmax.f32 %v219_v24, %v220_v34  ;;  %v227_v43 = vrot.slane %v226_v35, 1  ;;  %v232_v45 = vrot.slane %v231_v39, 2  ;;  %v469_v24 = vld [vmem:[%s2739_s6 + $0xc0] sm:$0xff]  ;;  %v467_v37 = vld [vmem:[%s2739_s6 + $0xb0] sm:$0xff] }
  0x2c   :  { %v243_v47 = vsel %vm68_vm0, %v2094_v20, -inf  ;;  %v291_v48 = vsel %vm264_vm5, %v207_v40, %v290_v41  ;;  %v1918_v51 = vmov 0.0   ;;  %v70_v54 = vrot.slane %v2072_v36, 4 }
  0x2d   :  { %v228_v49 = vmax.f32 %v226_v35, %v227_v43  ;;  %v244_v50 = vrot.slane %v243_v47, 4  ;;  %v301_v62 = vsel %vm256_vm1, %v221_v42, %v214_v38  ;;  %1782 = vmatprep.subr.mxu0 %v1918_v51  ;;  %292 = vrot.lane.b32.xlu0 %v291_v48, %s1919_s25  ;;  %v233_v55 = vmax.f32 %v231_v39, %v232_v45  ;;  %v323_v39 = vld [vmem:[%s2760_s22 + $0x48] sm:$0xff]  ;;  %v322_v43 = vld [vmem:[%s2760_s22 + $0x40] sm:$0xff] }
  0x2e   :  { %v238_v20 = vmax.f32 %v236_v61, %v237_v46  ;;  %1783 = vmatpush3.msra.mxu0 %v329_v44  ;;  %v78_v57 = vadd.f32 %v77_v9, %v2031_v5  ;;  %v85_v60 = vadd.f32 %v84_v12, %v2034_v6  ;;  %v92_v63 = vadd.f32 %v91_v13, %v2042_v10  ;;  %v475_v5 = vld [vmem:[%s2739_s6 + $0xf0] sm:$0xff]  ;;  %v474_v9 = vld [vmem:[%s2739_s6 + $0xe8] sm:$0xff]  ;;  %v473_v12 = vld [vmem:[%s2739_s6 + $0xe0] sm:$0xff] }
  0x2f   :  { %v245_v58 = vmax.f32 %v243_v47, %v244_v50  ;;  %v302_v59 = vsel %vm258_vm2, %v228_v49, %v301_v62  ;;  %1784 = vmatprep.subr.mxu0 %v1918_v51  ;;  %v234_v16 = vrot.slane %v233_v55, 1  ;;  %v99_v10 = vadd.f32 %v98_v17, %v2045_v11  ;;  %524 = vmatpush1.msra.mxu1 %v475_v5  ;;  %v472_v11 = vld [vmem:[%s2739_s6 + $0xd8] sm:$0xff]  ;;  %v466_v45 = vld [vmem:[%s2739_s6 + $0xa8] sm:$0xff]  ;;  %v465_v49 = vld [vmem:[%s2739_s6 + $0xa0] sm:$0xff] }
  0x30   :  { %v239_v1 = vrot.slane %v238_v20, 2  ;;  %1785 = vmatpush3.msra.mxu0 %v328_v53  ;;  %v79_v6 = vrot.slane %v78_v57, 2  ;;  %v86_v33 = vrot.slane %v85_v60, 2  ;;  %v93_v3 = vrot.slane %v92_v63, 2  ;;  %525 = vmatprep.subr.mxu1 %v474_v9  ;;  %v321_v50 = vld [vmem:[%s2760_s22 + $0x38] sm:$0xff]  ;;  %v319_v5 = vld [vmem:[%s2760_s22 + $0x28] sm:$0xff] }
  0x31   :  { %v246_v13 = vrot.slane %v245_v58, 2  ;;  %1786 = vmatprep.subr.mxu0 %v1918_v51  ;;  %v106_v4 = vadd.f32 %v105_v25, %v2050_v14  ;;  %v235_v17 = vmax.f32 %v233_v55, %v234_v16  ;;  %v100_v15 = vrot.slane %v99_v10, 2  ;;  %v325_v14 = vld [vmem:[%s2760_s22 + $0x58] sm:$0xff]  ;;  %526 = vmatpush1.msra.mxu1 %v473_v12  ;;  %v318_v12 = vld [vmem:[%s2760_s22 + $0x20] sm:$0xff] }
  0x32   :  { %v240_v7 = vmax.f32 %v238_v20, %v239_v1  ;;  %1787 = vmatpush3.msra.mxu0 %v327_v56  ;;  %v80_v8 = vadd.f32 %v79_v6, %v78_v57  ;;  %v87_v25 = vadd.f32 %v86_v33, %v85_v60  ;;  %v94_v23 = vadd.f32 %v93_v3, %v92_v63  ;;  %v464_v53 = vld [vmem:[%s2739_s6 + $0x98] sm:$0xff]  ;;  %v463_v20 = vld [vmem:[%s2739_s6 + $0x90] sm:$0xff] }
  0x33   :  { %v247_v19 = vmax.f32 %v245_v58, %v246_v13  ;;  %1788 = vmatprep.subr.mxu0 %v1918_v51  ;;  %v107_v52 = vrot.slane %v106_v4, 2  ;;  %527 = vmatprep.subr.mxu1 %v472_v11  ;;  %v303_v27 = vsel %vm260_vm3, %v235_v17, %v302_v59  ;;  %v101_v29 = vadd.f32 %v100_v15, %v99_v10  ;;  %v320_v56 = vld [vmem:[%s2760_s22 + $0x30] sm:$0xff]  ;;  %v462_v58 = vld [vmem:[%s2739_s6 + $0x88] sm:$0xff]  ;;  %v460_v16 = vld [vmem:[%s2739_s6 + $0x78] sm:$0xff] }
  0x34   :  { %v241_v22 = vrot.slane %v240_v7, 1  ;;  %1789 = vmatpush3.msra.mxu0 %v326_v2  ;;  %528 = vmatpush1.msra.mxu1 %v471_v18  ;;  %v81_v32 = vrot.slane %v80_v8, 1  ;;  %v71_v35 = vadd.f32 %v70_v54, %v2072_v36  ;;  %v88_v61 = vrot.slane %v87_v25, 1  ;;  %v459_v10 = vld [vmem:[%s2739_s6 + $0x70] sm:$0xff]  ;;  %v458_v2 = vld [vmem:[%s2739_s6 + $0x68] sm:$0xff]  ;;  %v317_v11 = vld [vmem:[%s2760_s22 + $0x18] sm:$0xff] }
  0x35   :  { %v248_v26 = vrot.slane %v247_v19, 1  ;;  %1790 = vmatprep.subr.mxu0 %v1918_v51  ;;  %v108_v34 = vadd.f32 %v107_v52, %v106_v4  ;;  %529 = vmatprep.subr.mxu1 %v470_v21  ;;  %v95_v41 = vrot.slane %v94_v23, 1  ;;  %v102_v44 = vrot.slane %v101_v29, 1  ;;  %v457_v4 = vld [vmem:[%s2739_s6 + $0x60] sm:$0xff]  ;;  %v455_v15 = vld [vmem:[%s2739_s6 + $0x50] sm:$0xff] }
  0x36   :  { %v242_v31 = vmax.f32 %v240_v7, %v241_v22  ;;  %1791 = vmatpush3.msra.mxu0 %v325_v14  ;;  %530 = vmatpush1.msra.mxu1 %v469_v24  ;;  %v72_v42 = vrot.slane %v71_v35, 2  ;;  %v82_v46 = vadd.f32 %v81_v32, %v80_v8  ;;  %v89_v62 = vadd.f32 %v88_v61, %v87_v25  ;;  %v456_v7 = vld [vmem:[%s2739_s6 + $0x58] sm:$0xff]  ;;  %v454_v14 = vld [vmem:[%s2739_s6 + $0x48] sm:$0xff]  ;;  %v453_v52 = vld [vmem:[%s2739_s6 + $0x40] sm:$0xff] }
  0x37   :  { %v249_v38 = vmax.f32 %v247_v19, %v248_v26  ;;  %1792 = vmatprep.subr.mxu0 %v1918_v51  ;;  %531 = vmatprep.subr.mxu1 %v468_v30  ;;  %v109_v47 = vrot.slane %v108_v34, 1  ;;  %v96_v54 = vadd.f32 %v95_v41, %v94_v23  ;;  %v103_v57 = vadd.f32 %v102_v44, %v101_v29  ;;  %v316_v19 = vld [vmem:[%s2760_s22 + $0x10] sm:$0xff]  ;;  %v2286_v21 = vld [vmem:[%s2740_s5] sm:$0xff]  ;;  %v315_v22 = vld [vmem:[%s2760_s22 + $0x8] sm:$0xff] }
  0x38   :  { %v304_v40 = vsel %vm262_vm4, %v242_v31, %v303_v27  ;;  %1793 = vmatpush3.msra.mxu0 %v324_v28  ;;  %532 = vmatpush1.msra.mxu1 %v467_v37  ;;  %v73_v48 = vadd.f32 %v72_v42, %v71_v35  ;;  %v113_v60 = vmul.f32 0.125, %v82_v46  ;;  %v114_v9 = vmul.f32 0.125, %v89_v62  ;;  %v452_v23 = vld [vmem:[%s2739_s6 + $0x38] sm:$0xff]  ;;  %v451_v24 = vld [vmem:[%s2739_s6 + $0x30] sm:$0xff]  ;;  %v314_v26 = vld [vmem:[%s2760_s22] sm:$0xff] }
  0x39   :  { %v305_v36 = vsel %vm264_vm5, %v249_v38, %v304_v40  ;;  %1794 = vmatprep.subr.mxu0 %v1918_v51  ;;  %1814 = vmatprep.mubr.msk.f32.mxu0 %vm1921_vm6, %v1918_v51  ;;  %v110_v59 = vadd.f32 %v109_v47, %v108_v34  ;;  %v115_v1 = vmul.f32 0.125, %v96_v54  ;;  %v116_v13 = vmul.f32 0.125, %v103_v57  ;;  %v450_v27 = vld [vmem:[%s2739_s6 + $0x28] sm:$0xff]  ;;  %v449_v29 = vld [vmem:[%s2739_s6 + $0x20] sm:$0xff]  ;;  %v448_v30 = vld [vmem:[%s2739_s6 + $0x18] sm:$0xff] }
  0x3a   :  { %306 = vrot.lane.b32.xlu1 %v305_v36, %s1920_s23  ;;  %1795 = vmatpush3.msra.mxu0 %v323_v39  ;;  %v74_v55 = vrot.slane %v73_v48, 1  ;;  %v512_v28 = vcombine.high %v2286_v21, %v2286_v21  ;;  %v447_v31 = vld [vmem:[%s2739_s6 + $0x10] sm:$0xff]  ;;  %v446_v32 = vld [vmem:[%s2739_s6 + $0x8] sm:$0xff]  ;;  %v445_v34 = vld [vmem:[%s2739_s6] sm:$0xff] }
  0x3b   :  { %1796 = vmatprep.subr.mxu0 %v1918_v51  ;;  %533 = vmatprep.subr.mxu1 %v466_v45  ;;  %v117_v33 = vmul.f32 0.125, %v110_v59  ;;  %v498_v35 = vld [vmem:[%s2739_s6 + $0x1a8] sm:$0xf]  ;;  %v497_v37 = vld [vmem:[%s2739_s6 + $0x1a0] sm:$0xf]  ;;  %v496_v38 = vld [vmem:[%s2739_s6 + $0x198] sm:$0xff] }
  0x3c   :  { %1797 = vmatpush3.msra.mxu0 %v322_v43  ;;  %534 = vmatpush1.msra.mxu1 %v465_v49  ;;  %v75_v63 = vadd.f32 %v74_v55, %v73_v48  ;;  %v495_v39 = vld [vmem:[%s2739_s6 + $0x190] sm:$0xff]  ;;  %v494_v61 = vld [vmem:[%s2739_s6 + $0x188] sm:$0xff]  ;;  %v493_v40 = vld [vmem:[%s2739_s6 + $0x180] sm:$0xff] }
  0x3d   :  { %1798 = vmatprep.subr.mxu0 %v1918_v51  ;;  %535 = vmatprep.subr.mxu1 %v464_v53  ;;  %v492_v41 = vld [vmem:[%s2739_s6 + $0x178] sm:$0xff]  ;;  %v491_v42 = vld [vmem:[%s2739_s6 + $0x170] sm:$0xff]  ;;  %v490_v36 = vld [vmem:[%s2739_s6 + $0x168] sm:$0xff] }
  0x3e   :  { %1799 = vmatpush3.msra.mxu0 %v321_v50  ;;  %536 = vmatpush1.msra.mxu1 %v463_v20  ;;  %v112_v6 = vmul.f32 0.125, %v75_v63  ;;  %v489_v43 = vld [vmem:[%s2739_s6 + $0x160] sm:$0xff]  ;;  %v488_v44 = vld [vmem:[%s2739_s6 + $0x158] sm:$0xff]  ;;  %v487_v45 = vld [vmem:[%s2739_s6 + $0x150] sm:$0xff] }
  0x3f   :  { %1800 = vmatprep.subr.mxu0 %v1918_v51  ;;  %537 = vmatprep.subr.mxu1 %v462_v58  ;;  %v486_v46 = vld [vmem:[%s2739_s6 + $0x148] sm:$0xff]  ;;  %v485_v47 = vld [vmem:[%s2739_s6 + $0x140] sm:$0xff]  ;;  %v484_v48 = vld [vmem:[%s2739_s6 + $0x138] sm:$0xff] }
  0x40   :  { %1801 = vmatpush3.msra.mxu0 %v320_v56  ;;  %538 = vmatpush1.msra.mxu1 %v461_v0  ;;  %v257_v3 = vsel %vm256_vm1, %v113_v60, %v112_v6  ;;  %v483_v49 = vld [vmem:[%s2739_s6 + $0x130] sm:$0xff]  ;;  %v482_v50 = vld [vmem:[%s2739_s6 + $0x128] sm:$0xff]  ;;  %v481_v62 = vld [vmem:[%s2739_s6 + $0x120] sm:$0xff] }
  0x41   :  { %1802 = vmatprep.subr.mxu0 %v1918_v51  ;;  %539 = vmatprep.subr.mxu1 %v460_v16  ;;  %v259_v17 = vsel %vm258_vm2, %v114_v9, %v257_v3  ;;  %v480_v53 = vld [vmem:[%s2739_s6 + $0x118] sm:$0xff]  ;;  %v479_v54 = vld [vmem:[%s2739_s6 + $0x110] sm:$0xff]  ;;  %v478_v55 = vld [vmem:[%s2739_s6 + $0x108] sm:$0xff]  ;;  %v424_v16 = vlaneseq  ;;  %vm1624_vm2 = vcmask 326912  }
  0x42   :  { %1803 = vmatpush3.msra.mxu0 %v319_v5  ;;  %540 = vmatpush1.msra.mxu1 %v459_v10  ;;  %v261_v8 = vsel %vm260_vm3, %v115_v1, %v259_v17  ;;  %v477_v20 = vld [vmem:[%s2739_s6 + $0x100] sm:$0xff]  ;;  %vm1631_vm3 = vcmask 392512  }
  0x43   :  { %1804 = vmatprep.subr.mxu0 %v1918_v51  ;;  %541 = vmatprep.subr.mxu1 %v458_v2  ;;  %v263_v18 = vsel %vm262_vm4, %v116_v13, %v261_v8  ;;  %v1697_v0 = vld [vmem:[%s2741_s2] ss:$0 sm:$0xff]  ;;  %v2398_v10 = vshrl.u32 %v424_v16, 7  ;;  %vm1638_vm4 = vcmask 458112  }
  0x44   :  { %1805 = vmatpush3.msra.mxu0 %v318_v12  ;;  %542 = vmatpush1.msra.mxu1 %v457_v4  ;;  %v2278_v25 = vsel %vm264_vm5, %v117_v33, %v263_v18  ;;  %v499_v13 = vld [vmem:[%s2742_s7] sm:$0x3]  ;;  %vm1645_vm5 = vcmask 523712  }
  0x45   :  { %1806 = vmatprep.subr.mxu0 %v1918_v51  ;;  %543 = vmatprep.subr.mxu1 %v456_v7  ;;  %v2401_v12 = vsub.s32 0, %v2398_v10  ;;  %v2414_v4 = vsub.s32 1, %v2398_v10 }
  0x46   :  { %1807 = vmatpush3.msra.mxu0 %v317_v11  ;;  %544 = vmatpush1.msra.mxu1 %v455_v15 }
  0x47   :  { %1808 = vmatprep.subr.mxu0 %v1918_v51  ;;  %545 = vmatprep.subr.mxu1 %v454_v14  ;;  %v504_v2 = vrot.slane %v499_v13, %v2401_v12  ;;  %v508_v17 = vrot.slane %v499_v13, %v2414_v4 }
  0x48   :  { %1809 = vmatpush3.msra.mxu0 %v316_v19  ;;  %546 = vmatpush1.msra.mxu1 %v453_v52  ;;  %v753_v52 = vld [vmem:[%s2743_s8 + $0x10] sm:$0xff] }
  0x49   :  { %1810 = vmatprep.subr.mxu0 %v1918_v51  ;;  %547 = vmatprep.subr.mxu1 %v452_v23  ;;  %v2437_v23 = vld [vmem:[%s2744_s9 + $0x18] sm:$0xff] }
  0x4a   :  { %1811 = vmatpush3.msra.mxu0 %v315_v22  ;;  %548 = vmatpush1.msra.mxu1 %v451_v24  ;;  %v751_v22 = vld [vmem:[%s2743_s8] sm:$0xff] }
  0x4b   :  { %1812 = vmatprep.subr.mxu0 %v1918_v51  ;;  %549 = vmatprep.subr.mxu1 %v450_v27 }
  0x4c   :  { %1813 = vmatpush3.msra.mxu0 %v314_v26  ;;  %550 = vmatpush1.msra.mxu1 %v449_v29 }
  0x4d   :  { %1700 = vmatprep.mubr.msk.f32.mxu1 %vm513_vm7, %v512_v28  ;;  %551 = vmatprep.subr.mxu1 %v448_v30  ;;  %v1922_v30 = vmov 1983009808  }
  0x4e   :  { %552 = vmatpush1.msra.mxu1 %v447_v31  ;;  %v612_v31 = vunpack.c.l.s4 %v1922_v30  ;;  %v837_v30 = vld [vmem:[%s2744_s9 + $0x8] sm:$0xff] }
  0x4f   :  { %553 = vmatprep.subr.mxu1 %v446_v32 }
  0x50   :  { %554 = vmatpush1.msra.mxu1 %v445_v34 }
  0x51   :  { %1698 = vmatprep.subr.msk.mxu1 %vm516_vm8, %v498_v35  ;;  %v2443_v35 = vld [vmem:[%s2745_s3] sm:$0x3] }
  0x52   :  { %1699 = vmatpush2.msk.msra.mxu1 %vm516_vm8, %v497_v37  ;;  %v613_v37 = vunpack.c.0.s8 %v612_v31  ;;  %v836_v31 = vld [vmem:[%s2744_s9] sm:$0xff] }
  0x53   :  { %567 = vmatprep.subr.mxu1 %v496_v38  ;;  %v1923_v38 = vmov 1966171168  }
  0x54   :  { %568 = vmatpush2.msra.mxu1 %v495_v39  ;;  %v680_v39 = vunpack.c.l.s4 %v1923_v38 }
  0x55   :  { %569 = vmatprep.subr.mxu1 %v494_v61  ;;  %v2448_v61 = vld [vmem:[%s2746_s4] sm:$0x3] }
  0x56   :  { %570 = vmatpush2.msra.mxu1 %v493_v40 }
  0x57   :  { %571 = vmatprep.subr.mxu1 %v492_v41  ;;  %v437_v41 = vrot.slane %v2443_v35, %v2414_v4 }
  0x58   :  { %572 = vmatpush2.msra.mxu1 %v491_v42 }
  0x59   :  { %573 = vmatprep.subr.mxu1 %v490_v36  ;;  %v616_v36 = vsub.s32 %v613_v37, %v2398_v10  ;;  %v924_v37 = vld [vmem:[%s2747_s10 + $0x18] sm:$0xff] }
  0x5a   :  { %574 = vmatpush2.msra.mxu1 %v489_v43  ;;  %v1924_v43 = vmov 1934713408  }
  0x5b   :  { %575 = vmatprep.subr.mxu1 %v488_v44  ;;  %v645_v44 = vunpack.c.l.s4 %v1924_v43  ;;  %v1269_v43 = vld [vmem:[%s2748_s12 + $0x30] sm:$0xff] }
  0x5c   :  { %576 = vmatpush2.msra.mxu1 %v487_v45 }
  0x5d   :  { %577 = vmatprep.subr.mxu1 %v486_v46  ;;  %v681_v46 = vunpack.c.0.s8 %v680_v39  ;;  %v923_v39 = vld [vmem:[%s2747_s10 + $0x10] sm:$0xff] }
  0x5e   :  { %578 = vmatpush2.msra.mxu1 %v485_v47 }
  0x5f   :  { %579 = vmatprep.subr.mxu1 %v484_v48  ;;  %v442_v48 = vrot.slane %v2448_v61, %v2414_v4 }
  0x60   :  { %580 = vmatpush2.msra.mxu1 %v483_v49 }
  0x61   :  { %581 = vmatprep.subr.mxu1 %v482_v50 }
  0x62   :  { %582 = vmatpush2.msra.mxu1 %v481_v62 }
  0x63   :  { %583 = vmatprep.subr.mxu1 %v480_v53 }
  0x64   :  { %584 = vmatpush2.msra.mxu1 %v479_v54  ;;  %v646_v54 = vunpack.c.0.s8 %v645_v44  ;;  %v1267_v44 = vld [vmem:[%s2748_s12 + $0x20] sm:$0xff] }
  0x65   :  { %585 = vmatprep.subr.mxu1 %v478_v55 }
  0x66   :  { %586 = vmatpush2.msra.mxu1 %v477_v20 }
  0x67   :  { %588 = vmatmul.mubr.f32.vlgmr.msra.gmra.mxu1 %v2286_v21  ;;  %v752_v21 = vld [vmem:[%s2743_s8 + $0x8] sm:$0xff] }
  0x91   :  { %v279_v56 = vpop.permute.xlu0 %278 }
  0x92   :  { %v309_v58 = vsel %vm68_vm0, %v2278_v25, %v279_v56  ;;  %v754_v25 = vld [vmem:[%s2743_s8 + $0x18] sm:$0xff]  ;;  %v2460_v56 = vsub.s32 %v681_v46, %v2398_v10  ;;  %v1265_v46 = vld [vmem:[%s2748_s12 + $0x10] sm:$0xff] }
  0x93   :  { %1817 = vmatprep.subr.mxu0 %v754_v25 }
  0x9f   :  { %v293_v57 = vpop.permute.xlu0 %292 }
  0xa0   :  { %v311_v59 = vsel %vm310_vm9, %v309_v58, %v293_v57 }
  0xac   :  { %v307_v60 = vpop.permute.xlu1 %306 }
  0xad   :  { %v313_v63 = vsel %vm312_vm10, %v311_v59, %v307_v60  ;;  %v649_v60 = vsub.s32 %v646_v54, %v2398_v10 }
  0xae   :  { %1815 = vmatmul.mubr.f32.vlgmr.msra.gmra.mxu0 %v313_v63 }
  0xaf   :  { %1818 = vmatpush3.msra.mxu0 %v754_v25 }
  0xb0   :  { %1819 = vmatprep.subr.mxu0 %v753_v52 }
  0xb1   :  { %1820 = vmatpush3.msra.mxu0 %v753_v52 }
  0xb2   :  { %1821 = vmatprep.subr.mxu0 %v752_v21 }
  0xb3   :  { %1822 = vmatpush3.msra.mxu0 %v752_v21 }
  0xb4   :  { %1823 = vmatprep.subr.mxu0 %v751_v22 }
  0xb5   :  { %1824 = vmatpush3.msra.mxu0 %v751_v22 }
  0xb6   :  { %1828 = vmatprep.subr.mxu0 %v2437_v23 }
 0x127   :  { %v589_v33 = vpop.f32.mrf.mxu1 }
 0x128   :  { %v2407_v3 = vadd.f32 %v589_v33, %v504_v2 }
 0x129   :  { %v591_v11 = vpop.f32.mrf.mxu1 }
 0x12a   :  { %v592_v7 = vadd.f32 %v591_v11, %v508_v17 }
 0x16e   :  { %v403_v5 = vpop.f32.mrf.mxu0 }
 0x16f   :  { %v404_v9 = vadd.f32 %v1697_v0, %v403_v5 }
 0x170   :  { %v1816_v1 = vpop.f32.mrf.mxu0 }
 0x171   :  { %v408_v6 = vsel %vm407_vm11, %v404_v9, 0.0 }
 0x172   :  { %409 = vadd.xlane.f32.xlu1 %v408_v6 }
 0x183   :  { %598 = vrot.lane.b32.xlu1 %v2407_v3, %s1919_s25 }
 0x187   :  { %601 = vrot.lane.b32.xlu1 %v2407_v3, %s1917_s26 }
 0x18b   :  { %605 = vrot.lane.b32.xlu1 %v592_v7, %s1920_s23 }
 0x1fb   :  { %v410_v8 = vpop.xlane.xlu1 %409 }
 0x1fc   :  { %v412_v15 = vmul.f32 0.03125, %v410_v8 }
 0x1fe   :  { %v413_v18 = vsub.f32 %v404_v9, %v412_v15 }
 0x1ff   :  { %v599_v29 = vpop.permute.xlu1 %598 }
 0x200   :  { %v414_v19 = vmul.f32 %v413_v18, %v413_v18  ;;  %v610_v49 = vcombine.low %v2407_v3, %v599_v29 }
 0x202   :  { %v415_v14 = vsel %vm407_vm11, %v414_v19, 0.0  ;;  %v617_v57 = vrot.slane %v610_v49, %v616_v36 }
 0x203   :  { %416 = vadd.xlane.f32.xlu0 %v415_v14  ;;  %v602_v32 = vpop.permute.xlu1 %601 }
 0x207   :  { %v606_v42 = vpop.permute.xlu1 %605 }
 0x208   :  { %v641_v53 = vrot.slane %v606_v42, %v616_v36  ;;  %v921_v42 = vld [vmem:[%s2747_s10] sm:$0xff] }
 0x219   :  { %595 = vrot.lane.b32.xlu0 %v2407_v3, %s1920_s23 }
 0x21d   :  { %607 = vrot.lane.b32.xlu0 %v592_v7, %s1919_s25 }
 0x28c   :  { %v417_v24 = vpop.xlane.xlu0 %416 }
 0x28d   :  { %v418_v26 = vmul.f32 0.03125, %v417_v24 }
 0x28f   :  { %v419_v27 = vadd.f32 1e-05, %v418_v26 }
 0x290   :  { %v596_v28 = vpop.permute.xlu0 %595 }
 0x291   :  { %1915 = vrsqrt.f32 %v419_v27  ;;  %v618_v45 = vcombine.low %v596_v28, %v602_v32  ;;  %v838_v27 = vld [vmem:[%s2744_s9 + $0x10] sm:$0xff] }
 0x293   :  { %v625_v55 = vrot.slane %v618_v45, %v616_v36  ;;  %v1266_v45 = vld [vmem:[%s2748_s12 + $0x18] sm:$0xff] }
 0x294   :  { %v608_v34 = vpop.permute.xlu0 %607 }
 0x295   :  { %v626_v40 = vcombine.low %v592_v7, %v608_v34  ;;  %v642_v63 = vcombine.low %v617_v57, %v625_v55  ;;  %v643_v33 = vcombine.high %v617_v57, %v625_v55 }
 0x297   :  { %v633_v62 = vrot.slane %v626_v40, %v616_v36  ;;  %v650_v3 = vrot.slane %v642_v63, %v649_v60  ;;  %v657_v14 = vrot.slane %v643_v33, %v649_v60  ;;  %v922_v40 = vld [vmem:[%s2747_s10 + $0x8] sm:$0xff] }
 0x299   :  { %v658_v58 = vcombine.low %v633_v62, %v641_v53  ;;  %v659_v9 = vcombine.high %v633_v62, %v641_v53 }
 0x29b   :  { %v666_v1 = vrot.slane %v658_v58, %v649_v60  ;;  %v673_v7 = vrot.slane %v659_v9, %v649_v60 }
 0x29d   :  { %v674_v8 = vcombine.low %v650_v3, %v666_v1  ;;  %v675_v52 = vcombine.high %v650_v3, %v666_v1  ;;  %v676_v24 = vcombine.low %v657_v14, %v673_v7  ;;  %v677_v34 = vcombine.high %v657_v14, %v673_v7 }
 0x29e   :  { %v1916_v47 = vpop.eup %1915 }
 0x29f   :  { %v2456_v50 = vmul.f32 %v1916_v47, %v413_v18  ;;  %v1264_v47 = vld [vmem:[%s2748_s12 + $0x8] sm:$0xff] }
 0x2a1   :  { %v438_v20 = vmul.f32 %v437_v41, %v2456_v50 }
 0x2a3   :  { %v443_v59 = vadd.f32 %v442_v48, %v438_v20  ;;  %v1263_v48 = vld [vmem:[%s2748_s12] sm:$0xff] }
 0x2a5   :  { %v685_v0 = vrot.slane %v443_v59, %v2460_v56  ;;  %v716_v5 = vcombine.high %v443_v59, %v443_v59 }
 0x2a7   :  { %v686_v6 = vcombine.high %v685_v0, %v685_v0  ;;  %v693_v13 = vrot.slane %v685_v0, %v2460_v56  ;;  %v723_v2 = vrot.slane %v716_v5, %v2460_v56 }
 0x2a9   :  { %v701_v4 = vcombine.high %v693_v13, %v693_v13  ;;  %v700_v11 = vrot.slane %v686_v6, %v2460_v56  ;;  %v731_v17 = vrot.slane %v723_v2, %v2460_v56  ;;  %v724_v19 = vcombine.high %v723_v2, %v723_v2 }
 0x2ab   :  { %v706_v15 = vrot.slane %v701_v4, %v2401_v12  ;;  %v702_v18 = vcombine.high %v700_v11, %v700_v11  ;;  %v742_v25 = vrot.slane %v731_v17, %v2401_v12  ;;  %v738_v28 = vrot.slane %v724_v19, %v2460_v56  ;;  %v925_v4 = vld [vmem:[%s2749_s11] sm:$0x3] }
 0x2ad   :  { %v714_v21 = vsel %vm713_vm12, %v674_v8, %v706_v15  ;;  %v710_v22 = vrot.slane %v702_v18, %v2401_v12  ;;  %v749_v29 = vsel %vm713_vm12, %v676_v24, %v742_v25  ;;  %v746_v32 = vrot.slane %v738_v28, %v2401_v12 }
 0x2ae   :  { %1825 = vmatprep.mubr.msk.f32.mxu0 %vm68_vm0, %v714_v21 }
 0x2af   :  { %v715_v26 = vsel %vm713_vm12, %v675_v52, %v710_v22  ;;  %v750_v38 = vsel %vm713_vm12, %v677_v34, %v746_v32 }
 0x2b0   :  { %1826 = vmatmul.mubr.msk.f32.vlgmr.msra.gmra.mxu0 %vm68_vm0, %v715_v26 }
 0x2b1   :  { %1829 = vmatpush3.msra.mxu0 %v2437_v23  ;;  %1836 = vmatprep.mubr.msk.f32.mxu0 %vm68_vm0, %v749_v29  ;;  %v427_v23 = vrot.slane %v2443_v35, %v2401_v12  ;;  %v432_v35 = vrot.slane %v2448_v61, %v2401_v12  ;;  %v1270_v61 = vld [vmem:[%s2748_s12 + $0x38] sm:$0xff] }
 0x2b2   :  { %1830 = vmatprep.subr.mxu0 %v838_v27  ;;  %1890 = vmatprep.subr.mxu1 %v1270_v61 }
 0x2b3   :  { %1831 = vmatpush3.msra.mxu0 %v838_v27  ;;  %v428_v41 = vmul.f32 %v427_v23, %v2456_v50  ;;  %1898 = vmatpush3.msra.mxu1 %v1270_v61 }
 0x2b4   :  { %1832 = vmatprep.subr.mxu0 %v837_v30  ;;  %1891 = vmatprep.subr.mxu1 %v1269_v43 }
 0x2b5   :  { %1833 = vmatpush3.msra.mxu0 %v837_v30  ;;  %v433_v36 = vadd.f32 %v432_v35, %v428_v41  ;;  %1899 = vmatpush3.msra.mxu1 %v1269_v43 }
 0x2b6   :  { %1834 = vmatprep.subr.mxu0 %v836_v31 }
 0x2b7   :  { %1835 = vmatpush3.msra.mxu0 %v836_v31 }
 0x2b8   :  { %1837 = vmatmul.mubr.msk.f32.vlgmr.msra.gmra.mxu0 %vm68_vm0, %v750_v38  ;;  %1839 = vmatprep.subr.mxu0 %v1918_v51 }
 0x2b9   :  { %1840 = vmatpush3.msra.mxu0 %v924_v37  ;;  %1847 = vmatprep.mubr.msk.f32.mxu0 %vm1921_vm6, %v1918_v51 }
 0x2ba   :  { %1841 = vmatprep.subr.mxu0 %v1918_v51 }
 0x2bb   :  { %1842 = vmatpush3.msra.mxu0 %v923_v39 }
 0x2bc   :  { %1843 = vmatprep.subr.mxu0 %v1918_v51 }
 0x2bd   :  { %1844 = vmatpush3.msra.mxu0 %v922_v40 }
 0x2be   :  { %1845 = vmatprep.subr.mxu0 %v1918_v51  ;;  %v1268_v51 = vld [vmem:[%s2748_s12 + $0x28] sm:$0xff] }
 0x2bf   :  { %1846 = vmatpush3.msra.mxu0 %v921_v42  ;;  %1892 = vmatprep.subr.mxu1 %v1268_v51 }
 0x2c0   :  { %1848 = vmatmul.mubr.msk.f32.vlgmr.msra.gmra.mxu0 %vm68_vm0, %v433_v36  ;;  %1850 = vmatprep.subr.mxu0 %v1270_v61 }
 0x2c1   :  { %1851 = vmatpush3.msra.mxu0 %v1270_v61  ;;  %1900 = vmatpush3.msra.mxu1 %v1268_v51 }
 0x2c2   :  { %1852 = vmatprep.subr.mxu0 %v1269_v43  ;;  %1893 = vmatprep.subr.mxu1 %v1267_v44 }
 0x2c3   :  { %1853 = vmatpush3.msra.mxu0 %v1269_v43  ;;  %1901 = vmatpush3.msra.mxu1 %v1267_v44 }
 0x2c4   :  { %1854 = vmatprep.subr.mxu0 %v1268_v51  ;;  %1894 = vmatprep.subr.mxu1 %v1266_v45 }
 0x2c5   :  { %1855 = vmatpush3.msra.mxu0 %v1268_v51  ;;  %1902 = vmatpush3.msra.mxu1 %v1266_v45 }
 0x2c6   :  { %1856 = vmatprep.subr.mxu0 %v1267_v44  ;;  %1895 = vmatprep.subr.mxu1 %v1265_v46 }
 0x2c7   :  { %1857 = vmatpush3.msra.mxu0 %v1267_v44  ;;  %1903 = vmatpush3.msra.mxu1 %v1265_v46 }
 0x2c8   :  { %1858 = vmatprep.subr.mxu0 %v1266_v45  ;;  %1896 = vmatprep.subr.mxu1 %v1264_v47 }
 0x2c9   :  { %1859 = vmatpush3.msra.mxu0 %v1266_v45  ;;  %1904 = vmatpush3.msra.mxu1 %v1264_v47 }
 0x2ca   :  { %1860 = vmatprep.subr.mxu0 %v1265_v46  ;;  %1897 = vmatprep.subr.mxu1 %v1263_v48 }
 0x2cb   :  { %1861 = vmatpush3.msra.mxu0 %v1265_v46  ;;  %1905 = vmatpush3.msra.mxu1 %v1263_v48 }
 0x2cc   :  { %1862 = vmatprep.subr.mxu0 %v1264_v47 }
 0x2cd   :  { %1863 = vmatpush3.msra.mxu0 %v1264_v47 }
 0x2ce   :  { %1864 = vmatprep.subr.mxu0 %v1263_v48 }
 0x2cf   :  { %1865 = vmatpush3.msra.mxu0 %v1263_v48 }
 0x370   :  { %v1827_v49 = vpop.f32.mrf.mxu0 }
 0x371   :  { %v1057_v53 = vrot.slane %v1827_v49, %v2460_v56  ;;  %v1050_v54 = vcombine.high %v1827_v49, %v1827_v49 }
 0x372   :  { %v827_v50 = vpop.f32.mrf.mxu0 }
 0x373   :  { %v1001_v62 = vcombine.high %v827_v50, %v827_v50  ;;  %v1008_v55 = vrot.slane %v827_v50, %v2460_v56  ;;  %v1065_v58 = vcombine.high %v1057_v53, %v1057_v53  ;;  %v1064_v59 = vrot.slane %v1050_v54, %v2460_v56 }
 0x374   :  { %v1073_v5 = vrot.slane %v1057_v53, %v2460_v56 }
 0x375   :  { %v1015_v20 = vrot.slane %v1001_v62, %v2460_v56  ;;  %v1016_v60 = vcombine.high %v1008_v55, %v1008_v55  ;;  %v1024_v9 = vrot.slane %v1008_v55, %v2460_v56  ;;  %v1087_v6 = vrot.slane %v1065_v58, %v2460_v56 }
 0x376   :  { %v1066_v13 = vcombine.high %v1064_v59, %v1064_v59  ;;  %v2553_v2 = vrot.slane %v1064_v59, %v2460_v56  ;;  %v1095_v17 = vcombine.high %v1073_v5, %v1073_v5  ;;  %v1134_v19 = vrot.slane %v1073_v5, %v2401_v12 }
 0x377   :  { %v1017_v57 = vcombine.high %v1015_v20, %v1015_v20  ;;  %v1031_v0 = vrot.slane %v1015_v20, %v2460_v56  ;;  %v1038_v33 = vrot.slane %v1016_v60, %v2460_v56  ;;  %v1046_v7 = vcombine.high %v1024_v9, %v1024_v9 }
 0x378   :  { %v2543_v63 = vpop.f32.mrf.mxu0  ;;  %v1097_v18 = vcombine.high %v1087_v6, %v1087_v6  ;;  %v2565_v25 = vrot.slane %v1066_v13, %v2460_v56  ;;  %v1096_v52 = vcombine.high %v2553_v2, %v2553_v2  ;;  %v1102_v22 = vrot.slane %v1024_v9, %v2401_v12 }
 0x379   :  { %v2549_v1 = vrot.slane %v1017_v57, %v2460_v56  ;;  %v1047_v11 = vcombine.high %v1031_v0, %v1031_v0  ;;  %v1048_v21 = vcombine.high %v1038_v33, %v1038_v33  ;;  %v1138_v26 = vrot.slane %v1087_v6, %v2401_v12 }
 0x37a   :  { %v2556_v3 = vpop.f32.mrf.mxu0  ;;  %v1106_v27 = vrot.slane %v1038_v33, %v2401_v12  ;;  %v1142_v30 = vrot.slane %v1095_v17, %v2401_v12  ;;  %v1110_v31 = vrot.slane %v1046_v7, %v2401_v12  ;;  %v1118_v32 = vrot.slane %v1031_v0, %v2401_v12 }
 0x37b   :  { %v1049_v8 = vcombine.high %v2549_v1, %v2549_v1  ;;  %v1126_v28 = vrot.slane %v1047_v11, %v2401_v12  ;;  %v1146_v23 = vrot.slane %v1097_v18, %v2401_v12  ;;  %v1150_v37 = vrot.slane %v2553_v2, %v2401_v12 }
 0x37c   :  { %v1114_v35 = vrot.slane %v1048_v21, %v2401_v12  ;;  %v1122_v40 = vrot.slane %v2549_v1, %v2401_v12  ;;  %v1179_v41 = vadd.f32 %v1102_v22, %v2556_v3  ;;  %v1187_v42 = vadd.f32 %v2543_v63, %v1134_v19 }
 0x37d   :  { %v1130_v34 = vrot.slane %v1049_v8, %v2401_v12  ;;  %v1185_v43 = vadd.f32 %v1126_v28, %v2556_v3  ;;  %v1180_v51 = vadd.f32 %v1106_v27, %v2556_v3  ;;  %v1181_v45 = vadd.f32 %v1110_v31, %v2556_v3 }
 0x37e   :  { %v1188_v46 = vadd.f32 %v2543_v63, %v1138_v26  ;;  %v1183_v47 = vadd.f32 %v1118_v32, %v2556_v3  ;;  %v1182_v54 = vadd.f32 %v1114_v35, %v2556_v3  ;;  %v1189_v55 = vadd.f32 %v2543_v63, %v1142_v30 }
 0x37f   :  { %v1186_v44 = vadd.f32 %v1130_v34, %v2556_v3  ;;  %v1098_v60 = vcombine.high %v2565_v25, %v2565_v25  ;;  %v1154_v33 = vrot.slane %v2565_v25, %v2401_v12  ;;  %v1190_v11 = vadd.f32 %v2543_v63, %v1146_v23  ;;  %v2637_v23 = vld [vmem:[%s2751_s13] ss:$0 sm:$0xff] }
 0x380   :  { %v995_v15 = vpop.f32.mrf.mxu0  ;;  %v1158_v17 = vrot.slane %v1096_v52, %v2401_v12  ;;  %v1191_v7 = vadd.f32 %v2543_v63, %v1150_v37 }
 0x381   :  { %v996_v14 = vadd.f32 %v995_v15, %v925_v4  ;;  %v1184_v4 = vadd.f32 %v1122_v40, %v2556_v3  ;;  %v1162_v52 = vrot.slane %v1098_v60, %v2401_v12  ;;  %v1192_v21 = vadd.f32 %v2543_v63, %v1154_v33 }
 0x382   :  { %v1849_v24 = vpop.f32.mrf.mxu0  ;;  %v1193_v22 = vadd.f32 %v2543_v63, %v1158_v17 }
 0x383   :  { %v1202_v29 = vrot.slane %v996_v14, %v2460_v56 }
 0x385   :  { %v1203_v38 = vcombine.high %v1202_v29, %v1202_v29  ;;  %v1210_v39 = vrot.slane %v1202_v29, %v2460_v56 }
 0x387   :  { %v1217_v36 = vrot.slane %v1203_v38, %v2460_v56  ;;  %v1221_v61 = vrot.slane %v1210_v39, %v2401_v12 }
 0x389   :  { %v1225_v48 = vrot.slane %v1217_v36, %v2401_v12  ;;  %v1228_v49 = vadd.f32 %v1221_v61, %v1179_v41  ;;  %v1234_v50 = vadd.f32 %v1221_v61, %v1185_v43  ;;  %v1229_v62 = vadd.f32 %v1221_v61, %v1180_v51  ;;  %v2645_v36 = vld [vmem:[%s2752_s14] ss:$0 sm:$0xff] }
 0x38a   :  { %v1235_v56 = vadd.f32 %v1221_v61, %v1186_v44  ;;  %v1230_v53 = vadd.f32 %v1221_v61, %v1181_v45  ;;  %v1231_v5 = vadd.f32 %v1221_v61, %v1182_v54  ;;  %v1232_v13 = vadd.f32 %v1221_v61, %v1183_v47 }
 0x38b   :  { %v1244_v20 = vmax.f32 %v1228_v49, 0.0  ;;  %v1250_v57 = vmax.f32 %v1234_v50, 0.0  ;;  %v1245_v58 = vmax.f32 %v1229_v62, 0.0  ;;  %v1236_v59 = vadd.f32 %v1225_v48, %v1187_v42 }
 0x38c   :  { %v1251_v0 = vmax.f32 %v1235_v56, 0.0  ;;  %v1237_v9 = vadd.f32 %v1225_v48, %v1188_v46  ;;  %v1246_v1 = vmax.f32 %v1230_v53, 0.0  ;;  %v1238_v2 = vadd.f32 %v1225_v48, %v1189_v55 }
 0x38d   :  { %1261 = vst.msk [vmem:[%s2750_s17] sm:$0x3] %vm1260_vm13, %v1244_v20  ;;  %1866 = vmatprep.mubr.msk.f32.mxu0 %vm310_vm9, %v1244_v20  ;;  %1875 = vmatprep.mubr.msk.f32.mxu1 %vm310_vm9, %v1250_v57  ;;  %v1252_v6 = vmax.f32 %v1236_v59, 0.0  ;;  %v1247_v8 = vmax.f32 %v1231_v5, 0.0  ;;  %v1233_v18 = vadd.f32 %v1221_v61, %v1184_v4  ;;  %v1239_v19 = vadd.f32 %v1225_v48, %v1190_v11 }
 0x38e   :  { %1867 = vmatmul.mubr.msk.f32.vlgmr.msra.gmra.mxu0 %vm310_vm9, %v1245_v58  ;;  %1876 = vmatmul.mubr.msk.f32.vlgmr.msra.gmra.mxu1 %vm310_vm9, %v1251_v0  ;;  %v1253_v15 = vmax.f32 %v1237_v9, 0.0  ;;  %v1248_v3 = vmax.f32 %v1232_v13, 0.0  ;;  %v1254_v14 = vmax.f32 %v1238_v2, 0.0  ;;  %v1240_v25 = vadd.f32 %v1225_v48, %v1191_v7 }
 0x38f   :  { %1869 = vmatprep.mubr.msk.f32.mxu0 %vm310_vm9, %v1246_v1  ;;  %1262 = vst.msk [vmem:[%s2750_s17 + $0x2] sm:$0x3] %vm1260_vm13, %v1252_v6  ;;  %1878 = vmatprep.mubr.msk.f32.mxu1 %vm310_vm9, %v1252_v6  ;;  %v1249_v24 = vmax.f32 %v1233_v18, 0.0  ;;  %v1255_v26 = vmax.f32 %v1239_v19, 0.0  ;;  %v1241_v27 = vadd.f32 %v1225_v48, %v1192_v21  ;;  %v1242_v29 = vadd.f32 %v1225_v48, %v1193_v22 }
 0x390   :  { %v1256_v28 = vmax.f32 %v1240_v25, 0.0  ;;  %v1194_v12 = vadd.f32 %v2543_v63, %v1162_v52 }
 0x391   :  { %v1257_v30 = vmax.f32 %v1241_v27, 0.0  ;;  %v1258_v32 = vmax.f32 %v1242_v29, 0.0 }
 0x392   :  { %1870 = vmatmul.mubr.msk.f32.gmra.mxu0 %vm310_vm9, %v1247_v8  ;;  %1879 = vmatmul.mubr.msk.f32.gmra.mxu1 %vm310_vm9, %v1253_v15  ;;  %v1243_v31 = vadd.f32 %v1225_v48, %v1194_v12 }
 0x393   :  { %1872 = vmatprep.mubr.msk.f32.mxu0 %vm310_vm9, %v1248_v3  ;;  %1881 = vmatprep.mubr.msk.f32.mxu1 %vm310_vm9, %v1254_v14 }
 0x394   :  { %v1259_v34 = vmax.f32 %v1243_v31, 0.0 }
 0x396   :  { %1873 = vmatmul.mubr.msk.f32.gmra.mxu0 %vm310_vm9, %v1249_v24  ;;  %1882 = vmatmul.mubr.msk.f32.gmra.mxu1 %vm310_vm9, %v1255_v26 }
 0x397   :  { %1884 = vmatprep.mubr.msk.f32.mxu1 %vm310_vm9, %v1256_v28 }
 0x39a   :  { %1885 = vmatmul.mubr.msk.f32.gmra.mxu1 %vm310_vm9, %v1257_v30 }
 0x39b   :  { %1887 = vmatprep.mubr.msk.f32.mxu1 %vm310_vm9, %v1258_v32 }
 0x39e   :  { %1888 = vmatmul.mubr.msk.f32.gmra.mxu1 %vm310_vm9, %v1259_v34 }
 0x44e   :  { %v1868_v37 = vpop.f32.mrf.mxu0  ;;  %v1877_v38 = vpop.f32.mrf.mxu1 }
 0x44f   :  { %v1398_v63 = vadd.f32 %v1868_v37, %v2637_v23  ;;  %v1428_v26 = vadd.f32 %v1877_v38, %v2637_v23 }
 0x450   :  { %v1392_v39 = vpop.f32.mrf.mxu0  ;;  %v1422_v35 = vpop.f32.mrf.mxu1 }
 0x451   :  { %v1472_v40 = vmax.f32 %v1398_v63, 0.0  ;;  %v1393_v41 = vadd.f32 %v2637_v23, %v1392_v39  ;;  %v1423_v42 = vadd.f32 %v2637_v23, %v1422_v35  ;;  %v1478_v37 = vmax.f32 %v1428_v26, 0.0 }
 0x452   :  { %v1871_v61 = vpop.f32.mrf.mxu0  ;;  %v1880_v43 = vpop.f32.mrf.mxu1 }
 0x453   :  { %v1471_v51 = vmax.f32 %v1393_v41, 0.0  ;;  %v1477_v44 = vmax.f32 %v1423_v42, 0.0  ;;  %v1408_v45 = vadd.f32 %v1871_v61, %v2637_v23  ;;  %v1438_v46 = vadd.f32 %v1880_v43, %v2637_v23 }
 0x454   :  { %v1402_v47 = vpop.f32.mrf.mxu0  ;;  %v1432_v48 = vpop.f32.mrf.mxu1  ;;  %v1495_v49 = vmul.f32 %v2645_v36, %v1472_v40  ;;  %v1501_v61 = vmul.f32 %v2645_v36, %v1478_v37 }
 0x455   :  { %v1474_v50 = vmax.f32 %v1408_v45, 0.0  ;;  %v1480_v62 = vmax.f32 %v1438_v46, 0.0  ;;  %v1433_v56 = vadd.f32 %v2637_v23, %v1432_v48  ;;  %v1403_v53 = vadd.f32 %v2637_v23, %v1402_v47 }
 0x456   :  { %v1883_v54 = vpop.f32.mrf.mxu1  ;;  %v1513_v55 = vsel %vm68_vm0, %v1495_v49, 0.0  ;;  %v1494_v20 = vmul.f32 %v2645_v36, %v1471_v51  ;;  %v1500_v57 = vmul.f32 %v2645_v36, %v1477_v44  ;;  %v1874_v58 = vpop.f32.mrf.mxu0  ;;  %v1531_v46 = vsel %vm68_vm0, %v1501_v61, 0.0 }
 0x457   :  { %1514 = vadd.xlane.f32.xlu1 %v1513_v55  ;;  %v1479_v59 = vmax.f32 %v1433_v56, 0.0  ;;  %v1448_v60 = vadd.f32 %v1883_v54, %v2637_v23  ;;  %v1503_v9 = vmul.f32 %v2645_v36, %v1480_v62  ;;  %v1473_v1 = vmax.f32 %v1403_v53, 0.0 }
 0x458   :  { %v1442_v0 = vpop.f32.mrf.mxu1  ;;  %v1510_v5 = vsel %vm68_vm0, %v1494_v20, 0.0  ;;  %v1418_v6 = vadd.f32 %v1874_v58, %v2637_v23  ;;  %v1528_v2 = vsel %vm68_vm0, %v1500_v57, 0.0  ;;  %v1497_v33 = vmul.f32 %v2645_v36, %v1474_v50  ;;  %v1412_v4 = vpop.f32.mrf.mxu0 }
 0x459   :  { %1511 = vadd.xlane.f32.xlu0 %v1510_v5  ;;  %v1482_v11 = vmax.f32 %v1448_v60, 0.0  ;;  %v1443_v17 = vadd.f32 %v2637_v23, %v1442_v0  ;;  %v1537_v7 = vsel %vm68_vm0, %v1503_v9, 0.0  ;;  %v1502_v8 = vmul.f32 %v2645_v36, %v1479_v59 }
 0x45a   :  { %v1886_v13 = vpop.f32.mrf.mxu1  ;;  %v1476_v18 = vmax.f32 %v1418_v6, 0.0  ;;  %v1413_v19 = vadd.f32 %v2637_v23, %v1412_v4  ;;  %v1519_v3 = vsel %vm68_vm0, %v1497_v33, 0.0  ;;  %v1496_v14 = vmul.f32 %v2645_v36, %v1473_v1 }
 0x45b   :  { %1529 = vadd.xlane.f32.xlu1 %v1528_v2  ;;  %v1481_v25 = vmax.f32 %v1443_v17, 0.0  ;;  %v1458_v52 = vadd.f32 %v1886_v13, %v2637_v23  ;;  %v1534_v21 = vsel %vm68_vm0, %v1502_v8, 0.0  ;;  %v1505_v22 = vmul.f32 %v2645_v36, %v1482_v11 }
 0x45c   :  { %v1452_v15 = vpop.f32.mrf.mxu1  ;;  %v1475_v27 = vmax.f32 %v1413_v19, 0.0  ;;  %v1516_v28 = vsel %vm68_vm0, %v1496_v14, 0.0  ;;  %v1499_v29 = vmul.f32 %v2645_v36, %v1476_v18  ;;  %v1593_v58 = vand.u32 127, %v424_v16 }
 0x45d   :  { %1538 = vadd.xlane.f32.xlu0 %v1537_v7  ;;  %v1484_v12 = vmax.f32 %v1458_v52, 0.0  ;;  %v1453_v30 = vadd.f32 %v2637_v23, %v1452_v15  ;;  %v1543_v31 = vsel %vm68_vm0, %v1505_v22, 0.0  ;;  %v1504_v32 = vmul.f32 %v2645_v36, %v1481_v25 }
 0x45e   :  { %v1889_v24 = vpop.f32.mrf.mxu1  ;;  %v1525_v63 = vsel %vm68_vm0, %v1499_v29, 0.0  ;;  %v1498_v38 = vmul.f32 %v2645_v36, %v1475_v27  ;;  %v1605_v60 = vadd.s32 4294967280, %v1593_v58  ;;  %v1598_v5 = vadd.s32 4294967288, %v1593_v58 }
 0x45f   :  { %1520 = vadd.xlane.f32.xlu1 %v1519_v3  ;;  %v1483_v39 = vmax.f32 %v1453_v30, 0.0  ;;  %v1540_v40 = vsel %vm68_vm0, %v1504_v32, 0.0  ;;  %v1507_v41 = vmul.f32 %v2645_v36, %v1484_v12  ;;  %v1468_v43 = vadd.f32 %v1889_v24, %v2637_v23 }
 0x460   :  { %v1462_v34 = vpop.f32.mrf.mxu1  ;;  %v1522_v42 = vsel %vm68_vm0, %v1498_v38, 0.0  ;;  %v1596_v1 = vsub.s32 %v1593_v58, %v2398_v10  ;;  %v1612_v13 = vadd.s32 4294967272, %v1593_v58  ;;  %v1608_v2 = vsub.s32 %v1605_v60, %v2398_v10 }
 0x461   :  { %1535 = vadd.xlane.f32.xlu0 %v1534_v21  ;;  %v1463_v35 = vadd.f32 %v2637_v23, %v1462_v34  ;;  %v1549_v44 = vsel %vm68_vm0, %v1507_v41, 0.0  ;;  %v1506_v45 = vmul.f32 %v2645_v36, %v1483_v39  ;;  %v1486_v47 = vmax.f32 %v1468_v43, 0.0 }
 0x462   :  { %v1619_v4 = vadd.s32 4294967264, %v1593_v58  ;;  %v1601_v11 = vsub.s32 %v1598_v5, %v2398_v10  ;;  %v1626_v7 = vadd.s32 4294967256, %v1593_v58  ;;  %v1615_v18 = vsub.s32 %v1612_v13, %v2398_v10 }
 0x463   :  { %1517 = vadd.xlane.f32.xlu1 %v1516_v28  ;;  %v1485_v51 = vmax.f32 %v1463_v35, 0.0  ;;  %v1546_v48 = vsel %vm68_vm0, %v1506_v45, 0.0  ;;  %v1509_v62 = vmul.f32 %v2645_v36, %v1486_v47  ;;  %v1633_v27 = vadd.s32 4294967248, %v1593_v58 }
 0x464   :  { %v1622_v25 = vsub.s32 %v1619_v4, %v2398_v10  ;;  %v1629_v28 = vsub.s32 %v1626_v7, %v2398_v10  ;;  %v1640_v30 = vadd.s32 4294967240, %v1593_v58 }
 0x465   :  { %1544 = vadd.xlane.f32.xlu0 %v1543_v31  ;;  %v1508_v49 = vmul.f32 %v2645_v36, %v1485_v51  ;;  %v1555_v23 = vsel %vm68_vm0, %v1509_v62, 0.0  ;;  %v2696_v36 = vstv %s2753_s15  ;;  %v1636_v41 = vsub.s32 %v1633_v27, %v2398_v10 }
 0x467   :  { %1526 = vadd.xlane.f32.xlu1 %v1525_v63  ;;  %v1552_v50 = vsel %vm68_vm0, %v1508_v49, 0.0  ;;  %vm1617_vm0 = vcmask 261312  }
 0x469   :  { %1541 = vadd.xlane.f32.xlu0 %v1540_v40 }
 0x46b   :  { %1523 = vadd.xlane.f32.xlu1 %v1522_v42 }
 0x46d   :  { %1550 = vadd.xlane.f32.xlu0 %v1549_v44  ;;  %v1643_v44 = vsub.s32 %v1640_v30, %v2398_v10 }
 0x46f   :  { %1532 = vadd.xlane.f32.xlu1 %v1531_v46 }
 0x471   :  { %1547 = vadd.xlane.f32.xlu0 %v1546_v48 }
 0x475   :  { %1553 = vadd.xlane.f32.xlu0 %v1552_v50 }
 0x479   :  { %1556 = vadd.xlane.f32.xlu0 %v1555_v23 }
 0x4e0   :  { %v1515_v56 = vpop.xlane.xlu1 %1514 }
 0x4e1   :  { %v1561_v17 = vadd.f32 %v2696_v36, %v1515_v56 }
 0x4e2   :  { %v1512_v53 = vpop.xlane.xlu0 %1511 }
 0x4e3   :  { %v1560_v6 = vadd.f32 %v2696_v36, %v1512_v53  ;;  %v1602_v22 = vrot.slane %v1561_v17, %v1601_v11 }
 0x4e4   :  { %v1530_v54 = vpop.xlane.xlu1 %1529 }
 0x4e5   :  { %v1597_v15 = vrot.slane %v1560_v6, %v1596_v1  ;;  %v1566_v61 = vadd.f32 %v2696_v36, %v1530_v54 }
 0x4e6   :  { %v1539_v55 = vpop.xlane.xlu0 %1538 }
 0x4e7   :  { %v1569_v24 = vadd.f32 %v2696_v36, %v1539_v55  ;;  %v1604_v29 = vsel %vm1603_vm14, %v1602_v22, %v1597_v15  ;;  %v1637_v10 = vrot.slane %v1566_v61, %v1636_v41 }
 0x4e8   :  { %v1521_v20 = vpop.xlane.xlu1 %1520 }
 0x4e9   :  { %v1563_v26 = vadd.f32 %v2696_v36, %v1521_v20  ;;  %v1654_v38 = vrot.slane %v1569_v24, %v1601_v11 }
 0x4ea   :  { %v1536_v57 = vpop.xlane.xlu0 %1535 }
 0x4eb   :  { %v1568_v19 = vadd.f32 %v2696_v36, %v1536_v57  ;;  %v1616_v39 = vrot.slane %v1563_v26, %v1615_v18 }
 0x4ec   :  { %v1518_v59 = vpop.xlane.xlu1 %1517 }
 0x4ed   :  { %v1562_v33 = vadd.f32 %v2696_v36, %v1518_v59  ;;  %v1650_v12 = vrot.slane %v1568_v19, %v1596_v1 }
 0x4ee   :  { %v1545_v0 = vpop.xlane.xlu0 %1544 }
 0x4ef   :  { %v1609_v3 = vrot.slane %v1562_v33, %v1608_v2  ;;  %v1571_v32 = vadd.f32 %v2696_v36, %v1545_v0  ;;  %v1655_v43 = vsel %vm1603_vm14, %v1654_v38, %v1650_v12 }
 0x4f0   :  { %v1527_v9 = vpop.xlane.xlu1 %1526 }
 0x4f1   :  { %v1611_v31 = vsel %vm1610_vm15, %v1609_v3, %v1604_v29  ;;  %v1565_v35 = vadd.f32 %v2696_v36, %v1527_v9  ;;  %v1664_v45 = vrot.slane %v1571_v32, %v1615_v18 }
 0x4f2   :  { %v1542_v16 = vpop.xlane.xlu0 %1541  ;;  %v1618_v51 = vsel %vm1617_vm0, %v1616_v39, %v1611_v31 }
 0x4f3   :  { %v1570_v14 = vadd.f32 %v2696_v36, %v1542_v16  ;;  %v1630_v50 = vrot.slane %v1565_v35, %v1629_v28 }
 0x4f4   :  { %v1524_v8 = vpop.xlane.xlu1 %1523 }
 0x4f5   :  { %v1564_v52 = vadd.f32 %v2696_v36, %v1524_v8  ;;  %v1659_v34 = vrot.slane %v1570_v14, %v1608_v2 }
 0x4f6   :  { %v1551_v21 = vpop.xlane.xlu0 %1550 }
 0x4f7   :  { %v1623_v37 = vrot.slane %v1564_v52, %v1622_v25  ;;  %v1660_v46 = vsel %vm1610_vm15, %v1659_v34, %v1655_v43  ;;  %v1573_v62 = vadd.f32 %v2696_v36, %v1551_v21 }
 0x4f8   :  { %v1533_v42 = vpop.xlane.xlu1 %1532  ;;  %v1665_v54 = vsel %vm1617_vm0, %v1664_v45, %v1660_v46 }
 0x4f9   :  { %v1625_v47 = vsel %vm1624_vm2, %v1623_v37, %v1618_v51  ;;  %v1567_v23 = vadd.f32 %v2696_v36, %v1533_v42  ;;  %v1674_v58 = vrot.slane %v1573_v62, %v1629_v28 }
 0x4fa   :  { %v1548_v63 = vpop.xlane.xlu0 %1547  ;;  %v1632_v53 = vsel %vm1631_vm3, %v1630_v50, %v1625_v47 }
 0x4fb   :  { %v1572_v40 = vadd.f32 %v2696_v36, %v1548_v63  ;;  %v1644_v59 = vrot.slane %v1567_v23, %v1643_v44  ;;  %v1639_v0 = vsel %vm1638_vm4, %v1637_v10, %v1632_v53 }
 0x4fd   :  { %v1669_v48 = vrot.slane %v1572_v40, %v1622_v25  ;;  %v1646_v6 = vsel %vm1645_vm5, %v1644_v59, %v1639_v0 }
 0x4fe   :  { %v1554_v49 = vpop.xlane.xlu0 %1553 }
 0x4ff   :  { %v1574_v56 = vadd.f32 %v2696_v36, %v1554_v49  ;;  %v1670_v55 = vsel %vm1624_vm2, %v1669_v48, %v1665_v54 }
 0x500   :  { %v1675_v5 = vsel %vm1631_vm3, %v1674_v58, %v1670_v55 }
 0x501   :  { %v1679_v20 = vrot.slane %v1574_v56, %v1636_v41 }
 0x502   :  { %v1557_v57 = vpop.xlane.xlu0 %1556 }
 0x503   :  { %v1575_v60 = vadd.f32 %v2696_v36, %v1557_v57  ;;  %v1680_v1 = vsel %vm1638_vm4, %v1679_v20, %v1675_v5 }
 0x505   :  { %v1684_v9 = vrot.slane %v1575_v60, %v1643_v44 }
 0x507   :  { %v1685_v13 = vsel %vm1645_vm5, %v1684_v9, %v1680_v1 }
 0x508   :  { %v1686_v2 = vsel %vm256_vm1, %v1685_v13, %v1646_v6 }
 0x509   :  { %1688 = vst.msk [vmem:[%s2754_s16] sm:$0x3] %vm1260_vm13, %v1686_v2 }

</bundles_post_ra>
